<compile_context>
chip_gen: v5e
topology: v5e:2x2
jax: 0.10.0
libtpu: 0.0.40
codegen_flags: <defaults>
</compile_context>

<pallas_src>
import functools

import jax
import jax.numpy as jnp
from jax.experimental import pallas as pl
from jax.experimental.pallas import tpu as pltpu

SUBLANE = 8
NEG_SLOPE = 0.2


def _round_up(n, m):
    return ((n + m - 1) // m) * m


def _leaky_relu(x, slope=NEG_SLOPE):
    return jnp.where(x >= 0, x, slope * x)


def _chip_generation():
    """Best-effort TPU generation from device_kind; conservative on unknowns."""
    try:
        kind = jax.devices()[0].device_kind.lower()
    except Exception:  # defensive: never fail the forward over a perf knob
        return 0
    for gen in (7, 6, 5, 4, 3, 2):
        if f"v{gen}" in kind or f"tpu{gen}" in kind:
            return gen
    return 0


def mlp_kernel(x_ref,
               w1_ref, b1_ref, w2_ref, b2_ref, w3_ref, b3_ref,
               w4_ref, b4_ref, w5_ref, b5_ref,
               o_ref, *, ew_dtype):
    """fc1..fc5 (+ bias, leaky_relu(0.2) on fc1-4) for one TILE_M batch tile.

    ew_dtype: dtype for the elementwise bias/leaky_relu path (bf16 on v6e/v7x,
    f32 on v5e).  Matmul accumulation is always f32; the fc5 reduction and the
    final bias add are always f32.
    """

    def layer(x, w_ref, b_ref, out_dtype):
        # bf16 operands -> native MXU path on v5e/v6e/v7x; accumulate in f32.
        y = jnp.dot(x, w_ref[...], preferred_element_type=jnp.float32)
        y = y.astype(ew_dtype) + b_ref[...].astype(ew_dtype)
        y = _leaky_relu(y)
        return y.astype(out_dtype)

    x = x_ref[...]                                  # (TILE_M, z) bf16 straight from HBM
    x = layer(x, w1_ref, b1_ref, jnp.bfloat16)      # fc1 ; dropout = identity (eval)
    x = layer(x, w2_ref, b2_ref, jnp.bfloat16)      # fc2 ; dropout = identity (eval)
    x = layer(x, w3_ref, b3_ref, jnp.bfloat16)      # fc3 ; dropout = identity (eval)
    x = layer(x, w4_ref, b4_ref, jnp.float32)       # fc4 ; f32 for the fc5 reduction
    # fc5 (out dim 1): lane reduction on the VPU/XLU instead of an N=1 MXU matmul;
    # only the real logit column is written back (no 128-lane output padding).
    logits = jnp.sum(x * w5_ref[...], axis=-1, keepdims=True) + b5_ref[...]
    o_ref[...] = logits.astype(o_ref.dtype)


def init_params(key, z_size, hidden_dim):
    """f32 params matching nn.Linear shapes, stored transposed as (in, out)."""
    dims = [
        (z_size, hidden_dim * 8),           # fc1
        (hidden_dim * 8, hidden_dim * 4),   # fc2
        (hidden_dim * 4, hidden_dim * 2),   # fc3
        (hidden_dim * 2, hidden_dim),       # fc4
        (hidden_dim, 1),                    # fc5
    ]
    params = {}
    for i, (fan_in, fan_out) in enumerate(dims, start=1):
        key, kw, kb = jax.random.split(key, 3)
        bound = 1.0 / jnp.sqrt(fan_in)      # PyTorch nn.Linear default init range
        params[f"w{i}"] = jax.random.uniform(
            kw, (fan_in, fan_out), jnp.float32, -bound, bound)
        params[f"b{i}"] = jax.random.uniform(
            kb, (1, fan_out), jnp.float32, -bound, bound)
    return params


def prepare_params(params):
    """Kernel-side params: fc1-4 weights bf16 (natural shapes, no zero-lane
    padding), biases f32, fc5 weight as a (1, hidden) f32 row for a lane reduce."""
    prepped = {}
    for i in range(1, 5):
        prepped[f"w{i}"] = params[f"w{i}"].astype(jnp.bfloat16)
        prepped[f"b{i}"] = params[f"b{i}"].astype(jnp.float32)
    prepped["w5"] = params["w5"].reshape(1, -1).astype(jnp.float32)   # (1, hidden)
    prepped["b5"] = params["b5"].astype(jnp.float32)                  # (1, 1)
    return prepped


def _choose_tile(batch, tile_m):
    """Sublane-aligned batch tile; >= 2 grid steps whenever the batch permits
    (so v7x's two TensorCores both get work under dimension_semantics='parallel')."""
    tile_m = max(SUBLANE, _round_up(int(tile_m), SUBLANE))
    b8 = _round_up(batch, SUBLANE)
    if b8 < 2 * SUBLANE:                    # too small to split
        return b8
    half = _round_up(pl.cdiv(b8, 2), SUBLANE)
    return min(tile_m, half)


def _vmem_bytes_estimate(tile, params):
    """Conservative per-step VMEM footprint (double-buffered blocks + live values)."""
    resident = sum(int(v.size) * v.dtype.itemsize for v in params.values()) * 2
    x_blocks = 2 * tile * params["w1"].shape[0] * 2            # bf16 input, 2 buffers
    out_blocks = 2 * (tile // SUBLANE) * SUBLANE * 128 * 4     # (tile,1) pads to lane tiles
    widest = max(params[f"w{i}"].shape[1] for i in range(1, 5))
    live = 3 * tile * widest * 4                               # live f32/bf16 intermediates
    return resident + x_blocks + out_blocks + live


def latent_discriminator_mlp(code, params, *, tile_m=1024):
    """code: (B, z_size) float. params: prepare_params() output. Returns (B, 1) f32."""
    B, z = code.shape
    assert params["w1"].shape[0] == z

    tile = _choose_tile(B, tile_m)
    Bp = _round_up(B, tile)
    grid = Bp // tile

    # bf16 input halves the only large HBM->VMEM stream (weights already bf16).
    code_b = code.astype(jnp.bfloat16)
    if Bp != B:   # only materialize a padded copy when the batch isn't tile-aligned
        code_b = jnp.zeros((Bp, z), jnp.bfloat16).at[:B, :].set(code_b)

    gen = _chip_generation()
    # v5e and older: no bf16 VALU -> keep bias/leaky_relu in f32 there.
    ew_dtype = jnp.bfloat16 if gen >= 6 else jnp.float32

    args = (code_b,
            params["w1"], params["b1"], params["w2"], params["b2"],
            params["w3"], params["b3"], params["w4"], params["b4"],
            params["w5"], params["b5"])

    # Activations tiled over batch (double-buffered by BlockSpec); tiny weights /
    # biases use full-array blocks with a constant block index -> fetched once,
    # VMEM-resident across the whole grid.
    in_specs = [pl.BlockSpec((tile, z), lambda i: (i, 0))]
    for a in args[1:]:
        in_specs.append(pl.BlockSpec(a.shape, lambda i: (0, 0)))
    out_spec = pl.BlockSpec((tile, 1), lambda i: (i, 0))

    # Default scoped VMEM (32 MiB) is plenty for the default tile; only raise it
    # if a user-supplied huge tile needs it, with a generation-aware cap.
    vmem_limit = None
    need = _vmem_bytes_estimate(tile, params)
    if need > (24 << 20):
        cap = (40 << 20) if gen >= 7 else (96 << 20)
        vmem_limit = min(cap, _round_up(2 * need, 1 << 20))

    out_p = pl.pallas_call(
        functools.partial(mlp_kernel, ew_dtype=ew_dtype),
        out_shape=jax.ShapeDtypeStruct((Bp, 1), jnp.float32),
        grid=(grid,),
        in_specs=in_specs,
        out_specs=out_spec,
        compiler_params=pltpu.CompilerParams(
            dimension_semantics=("parallel",),   # shard batch tiles over v7x's 2 TCs
            vmem_limit_bytes=vmem_limit),
    )(*args)

    return out_p[:B] if Bp != B else out_p


def reference_forward(code, params):
    """Plain-JAX f32 reference of the eval-mode PyTorch forward."""
    x = _leaky_relu(code @ params["w1"] + params["b1"])
    x = _leaky_relu(x @ params["w2"] + params["b2"])
    x = _leaky_relu(x @ params["w3"] + params["b3"])
    x = _leaky_relu(x @ params["w4"] + params["b4"])
    return x @ params["w5"] + params["b5"]


if __name__ == "__main__":
    # Widths: 32 -> 256 -> 128 -> 64 -> 32 -> 1 ; batch 512 exercises a 2-step
    # "parallel" grid (tile is chosen as 256 so both v7x TensorCores get a tile).
    z_size, hidden_dim, batch = 32, 32, 512

    key = jax.random.PRNGKey(0)
    key, kx = jax.random.split(key)
    code = jax.random.normal(kx, (batch, z_size), jnp.float32)

    params = init_params(key, z_size, hidden_dim)
    kparams = prepare_params(params)

    out = latent_discriminator_mlp(code, kparams, tile_m=1024)
    out = jax.block_until_ready(out)
    assert out.shape == (batch, 1)

    # Reference uses the same bf16-rounded input/weights (cast back to f32) so the
    # remaining deltas are bf16 activation rounding + f32 MXU accumulation order.
    ref_params = {}
    for i in range(1, 5):
        ref_params[f"w{i}"] = kparams[f"w{i}"].astype(jnp.float32)
        ref_params[f"b{i}"] = params[f"b{i}"]
    ref_params["w5"] = params["w5"]
    ref_params["b5"] = params["b5"]
    ref = reference_forward(code.astype(jnp.bfloat16).astype(jnp.float32), ref_params)

    max_diff = float(jnp.max(jnp.abs(out - ref)))
    assert jnp.allclose(out, ref, atol=3e-2, rtol=3e-2), (
        f"mismatch vs reference (max abs diff {max_diff})")

    print("KERNEL_OK")
</pallas_src>

<mosaic_0001>
module attributes {stable_mosaic.version = 11 : i64} {
  func.func @mlp_kernel(%arg0: i32, %arg1: memref<256x32xbf16, #tpu.memory_space<vmem>>, %arg2: memref<32x256xbf16, #tpu.memory_space<vmem>>, %arg3: memref<1x256xf32, #tpu.memory_space<vmem>>, %arg4: memref<256x128xbf16, #tpu.memory_space<vmem>>, %arg5: memref<1x128xf32, #tpu.memory_space<vmem>>, %arg6: memref<128x64xbf16, #tpu.memory_space<vmem>>, %arg7: memref<1x64xf32, #tpu.memory_space<vmem>>, %arg8: memref<64x32xbf16, #tpu.memory_space<vmem>>, %arg9: memref<1x32xf32, #tpu.memory_space<vmem>>, %arg10: memref<1x32xf32, #tpu.memory_space<vmem>>, %arg11: memref<1x1xf32, #tpu.memory_space<vmem>>, %arg12: memref<256x1xf32, #tpu.memory_space<vmem>>) attributes {dimension_semantics = [#tpu.dimension_semantics<parallel>], iteration_bounds = array<i64: 2>, scalar_prefetch = 0 : i64, scratch_operands = 0 : i64, tpu.core_type = #tpu.core_type<tc>, window_params = [{transform_indices = @transform_0, window_bounds = array<i64: 256, 32>}, {pipeline_mode = #tpu.pipeline_mode<synchronous>, transform_indices = @transform_1, window_bounds = array<i64: 32, 256>}, {pipeline_mode = #tpu.pipeline_mode<synchronous>, transform_indices = @transform_2, window_bounds = array<i64: 1, 256>}, {pipeline_mode = #tpu.pipeline_mode<synchronous>, transform_indices = @transform_3, window_bounds = array<i64: 256, 128>}, {pipeline_mode = #tpu.pipeline_mode<synchronous>, transform_indices = @transform_4, window_bounds = array<i64: 1, 128>}, {pipeline_mode = #tpu.pipeline_mode<synchronous>, transform_indices = @transform_5, window_bounds = array<i64: 128, 64>}, {pipeline_mode = #tpu.pipeline_mode<synchronous>, transform_indices = @transform_6, window_bounds = array<i64: 1, 64>}, {pipeline_mode = #tpu.pipeline_mode<synchronous>, transform_indices = @transform_7, window_bounds = array<i64: 64, 32>}, {pipeline_mode = #tpu.pipeline_mode<synchronous>, transform_indices = @transform_8, window_bounds = array<i64: 1, 32>}, {pipeline_mode = #tpu.pipeline_mode<synchronous>, transform_indices = @transform_9, window_bounds = array<i64: 1, 32>}, {pipeline_mode = #tpu.pipeline_mode<synchronous>, transform_indices = @transform_10, window_bounds = array<i64: 1, 1>}, {transform_indices = @transform_11, window_bounds = array<i64: 256, 1>}]} {
    %c0 = arith.constant 0 : index
    %c0_0 = arith.constant 0 : index
    %0 = vector.load %arg1[%c0, %c0_0] : memref<256x32xbf16, #tpu.memory_space<vmem>>, vector<256x32xbf16>
    %c0_1 = arith.constant 0 : index
    %c0_2 = arith.constant 0 : index
    %1 = vector.load %arg2[%c0_1, %c0_2] : memref<32x256xbf16, #tpu.memory_space<vmem>>, vector<32x256xbf16>
    %cst = arith.constant dense<0.000000e+00> : vector<256x256xf32>
    %2 = tpu.matmul %0, %1, %cst {dimension_numbers = #tpu.dot_dimension_numbers<[1], [0], [0], [1], [0, 0, 1, 1], [], []>} : vector<256x32xbf16>, vector<32x256xbf16>, vector<256x256xf32> -> vector<256x256xf32>
    %c0_3 = arith.constant 0 : index
    %c0_4 = arith.constant 0 : index
    %3 = vector.load %arg3[%c0_3, %c0_4] : memref<1x256xf32, #tpu.memory_space<vmem>>, vector<1x256xf32>
    %4 = vector.broadcast %3 : vector<1x256xf32> to vector<256x256xf32>
    %5 = arith.addf %2, %4 : vector<256x256xf32>
    %cst_5 = arith.constant 0.000000e+00 : f32
    %6 = vector.broadcast %cst_5 : f32 to vector<256x256xf32>
    %7 = arith.cmpf oge, %5, %6 : vector<256x256xf32>
    %cst_6 = arith.constant 2.000000e-01 : f32
    %8 = vector.broadcast %cst_6 : f32 to vector<256x256xf32>
    %9 = arith.mulf %8, %5 : vector<256x256xf32>
    %10 = arith.select %7, %5, %9 : vector<256x256xi1>, vector<256x256xf32>
    %11 = arith.truncf %10 : vector<256x256xf32> to vector<256x256xbf16>
    %c0_7 = arith.constant 0 : index
    %c0_8 = arith.constant 0 : index
    %12 = vector.load %arg4[%c0_7, %c0_8] : memref<256x128xbf16, #tpu.memory_space<vmem>>, vector<256x128xbf16>
    %cst_9 = arith.constant dense<0.000000e+00> : vector<256x128xf32>
    %13 = tpu.matmul %11, %12, %cst_9 {dimension_numbers = #tpu.dot_dimension_numbers<[1], [0], [0], [1], [0, 0, 1, 1], [], []>} : vector<256x256xbf16>, vector<256x128xbf16>, vector<256x128xf32> -> vector<256x128xf32>
    %c0_10 = arith.constant 0 : index
    %c0_11 = arith.constant 0 : index
    %14 = vector.load %arg5[%c0_10, %c0_11] : memref<1x128xf32, #tpu.memory_space<vmem>>, vector<1x128xf32>
    %15 = vector.broadcast %14 : vector<1x128xf32> to vector<256x128xf32>
    %16 = arith.addf %13, %15 : vector<256x128xf32>
    %cst_12 = arith.constant 0.000000e+00 : f32
    %17 = vector.broadcast %cst_12 : f32 to vector<256x128xf32>
    %18 = arith.cmpf oge, %16, %17 : vector<256x128xf32>
    %cst_13 = arith.constant 2.000000e-01 : f32
    %19 = vector.broadcast %cst_13 : f32 to vector<256x128xf32>
    %20 = arith.mulf %19, %16 : vector<256x128xf32>
    %21 = arith.select %18, %16, %20 : vector<256x128xi1>, vector<256x128xf32>
    %22 = arith.truncf %21 : vector<256x128xf32> to vector<256x128xbf16>
    %c0_14 = arith.constant 0 : index
    %c0_15 = arith.constant 0 : index
    %23 = vector.load %arg6[%c0_14, %c0_15] : memref<128x64xbf16, #tpu.memory_space<vmem>>, vector<128x64xbf16>
    %cst_16 = arith.constant dense<0.000000e+00> : vector<256x64xf32>
    %24 = tpu.matmul %22, %23, %cst_16 {dimension_numbers = #tpu.dot_dimension_numbers<[1], [0], [0], [1], [0, 0, 1, 1], [], []>} : vector<256x128xbf16>, vector<128x64xbf16>, vector<256x64xf32> -> vector<256x64xf32>
    %c0_17 = arith.constant 0 : index
    %c0_18 = arith.constant 0 : index
    %25 = vector.load %arg7[%c0_17, %c0_18] : memref<1x64xf32, #tpu.memory_space<vmem>>, vector<1x64xf32>
    %26 = vector.broadcast %25 : vector<1x64xf32> to vector<256x64xf32>
    %27 = arith.addf %24, %26 : vector<256x64xf32>
    %cst_19 = arith.constant 0.000000e+00 : f32
    %28 = vector.broadcast %cst_19 : f32 to vector<256x64xf32>
    %29 = arith.cmpf oge, %27, %28 : vector<256x64xf32>
    %cst_20 = arith.constant 2.000000e-01 : f32
    %30 = vector.broadcast %cst_20 : f32 to vector<256x64xf32>
    %31 = arith.mulf %30, %27 : vector<256x64xf32>
    %32 = arith.select %29, %27, %31 : vector<256x64xi1>, vector<256x64xf32>
    %33 = arith.truncf %32 : vector<256x64xf32> to vector<256x64xbf16>
    %c0_21 = arith.constant 0 : index
    %c0_22 = arith.constant 0 : index
    %34 = vector.load %arg8[%c0_21, %c0_22] : memref<64x32xbf16, #tpu.memory_space<vmem>>, vector<64x32xbf16>
    %cst_23 = arith.constant dense<0.000000e+00> : vector<256x32xf32>
    %35 = tpu.matmul %33, %34, %cst_23 {dimension_numbers = #tpu.dot_dimension_numbers<[1], [0], [0], [1], [0, 0, 1, 1], [], []>} : vector<256x64xbf16>, vector<64x32xbf16>, vector<256x32xf32> -> vector<256x32xf32>
    %c0_24 = arith.constant 0 : index
    %c0_25 = arith.constant 0 : index
    %36 = vector.load %arg9[%c0_24, %c0_25] : memref<1x32xf32, #tpu.memory_space<vmem>>, vector<1x32xf32>
    %37 = vector.broadcast %36 : vector<1x32xf32> to vector<256x32xf32>
    %38 = arith.addf %35, %37 : vector<256x32xf32>
    %cst_26 = arith.constant 0.000000e+00 : f32
    %39 = vector.broadcast %cst_26 : f32 to vector<256x32xf32>
    %40 = arith.cmpf oge, %38, %39 : vector<256x32xf32>
    %cst_27 = arith.constant 2.000000e-01 : f32
    %41 = vector.broadcast %cst_27 : f32 to vector<256x32xf32>
    %42 = arith.mulf %41, %38 : vector<256x32xf32>
    %43 = arith.select %40, %38, %42 : vector<256x32xi1>, vector<256x32xf32>
    %c0_28 = arith.constant 0 : index
    %c0_29 = arith.constant 0 : index
    %44 = vector.load %arg10[%c0_28, %c0_29] : memref<1x32xf32, #tpu.memory_space<vmem>>, vector<1x32xf32>
    %45 = vector.broadcast %44 : vector<1x32xf32> to vector<256x32xf32>
    %46 = arith.mulf %43, %45 : vector<256x32xf32>
    %cst_30 = arith.constant dense<0.000000e+00> : vector<256xf32>
    %47 = vector.multi_reduction <add>, %46, %cst_30 [1] : vector<256x32xf32> to vector<256xf32>
    %48 = vector.shape_cast %47 : vector<256xf32> to vector<256x1xf32>
    %c0_31 = arith.constant 0 : index
    %c0_32 = arith.constant 0 : index
    %49 = vector.load %arg11[%c0_31, %c0_32] : memref<1x1xf32, #tpu.memory_space<vmem>>, vector<1x1xf32>
    %50 = vector.broadcast %49 : vector<1x1xf32> to vector<256x1xf32>
    %51 = arith.addf %48, %50 : vector<256x1xf32>
    %c0_33 = arith.constant 0 : index
    %c0_34 = arith.constant 0 : index
    %52 = vector.load %arg12[%c0_33, %c0_34] : memref<256x1xf32, #tpu.memory_space<vmem>>, vector<256x1xf32>
    tpu.vector_store %arg12[%c0_33, %c0_34], %51 {strides = array<i32>} : memref<256x1xf32, #tpu.memory_space<vmem>>, vector<256x1xf32>,
    return
  }
  func.func @transform_0(%arg0: i32) -> (i32, i32) {
    %c0_i32 = arith.constant 0 : i32
    %c0_i32_0 = arith.constant 0 : i32
    return %arg0, %c0_i32 : i32, i32
  }
  func.func @transform_1(%arg0: i32) -> (i32, i32) {
    %c0_i32 = arith.constant 0 : i32
    %c0_i32_0 = arith.constant 0 : i32
    %c0_i32_1 = arith.constant 0 : i32
    return %c0_i32, %c0_i32_0 : i32, i32
  }
  func.func @transform_2(%arg0: i32) -> (i32, i32) {
    %c0_i32 = arith.constant 0 : i32
    %c0_i32_0 = arith.constant 0 : i32
    %c0_i32_1 = arith.constant 0 : i32
    return %c0_i32, %c0_i32_0 : i32, i32
  }
  func.func @transform_3(%arg0: i32) -> (i32, i32) {
    %c0_i32 = arith.constant 0 : i32
    %c0_i32_0 = arith.constant 0 : i32
    %c0_i32_1 = arith.constant 0 : i32
    return %c0_i32, %c0_i32_0 : i32, i32
  }
  func.func @transform_4(%arg0: i32) -> (i32, i32) {
    %c0_i32 = arith.constant 0 : i32
    %c0_i32_0 = arith.constant 0 : i32
    %c0_i32_1 = arith.constant 0 : i32
    return %c0_i32, %c0_i32_0 : i32, i32
  }
  func.func @transform_5(%arg0: i32) -> (i32, i32) {
    %c0_i32 = arith.constant 0 : i32
    %c0_i32_0 = arith.constant 0 : i32
    %c0_i32_1 = arith.constant 0 : i32
    return %c0_i32, %c0_i32_0 : i32, i32
  }
  func.func @transform_6(%arg0: i32) -> (i32, i32) {
    %c0_i32 = arith.constant 0 : i32
    %c0_i32_0 = arith.constant 0 : i32
    %c0_i32_1 = arith.constant 0 : i32
    return %c0_i32, %c0_i32_0 : i32, i32
  }
  func.func @transform_7(%arg0: i32) -> (i32, i32) {
    %c0_i32 = arith.constant 0 : i32
    %c0_i32_0 = arith.constant 0 : i32
    %c0_i32_1 = arith.constant 0 : i32
    return %c0_i32, %c0_i32_0 : i32, i32
  }
  func.func @transform_8(%arg0: i32) -> (i32, i32) {
    %c0_i32 = arith.constant 0 : i32
    %c0_i32_0 = arith.constant 0 : i32
    %c0_i32_1 = arith.constant 0 : i32
    return %c0_i32, %c0_i32_0 : i32, i32
  }
  func.func @transform_9(%arg0: i32) -> (i32, i32) {
    %c0_i32 = arith.constant 0 : i32
    %c0_i32_0 = arith.constant 0 : i32
    %c0_i32_1 = arith.constant 0 : i32
    return %c0_i32, %c0_i32_0 : i32, i32
  }
  func.func @transform_10(%arg0: i32) -> (i32, i32) {
    %c0_i32 = arith.constant 0 : i32
    %c0_i32_0 = arith.constant 0 : i32
    %c0_i32_1 = arith.constant 0 : i32
    return %c0_i32, %c0_i32_0 : i32, i32
  }
  func.func @transform_11(%arg0: i32) -> (i32, i32) {
    %c0_i32 = arith.constant 0 : i32
    %c0_i32_0 = arith.constant 0 : i32
    return %arg0, %c0_i32 : i32, i32
  }
}

</mosaic_0001>

<bundles_post_ra>
// kernel: tpu_custom_call.1
= control target key start
LH: loop header
LB: loop body
LE: loop exit
PB: predicated region body
PF: predicated region fallthrough
CT: control target
= control target key end

     0   :  { %s2599_s19 = smov 0   ;;  %s3263_s0 = inlined_call_operand.vmem [shape: bf16[512,32], index: 0, kind: input, shape index: {}]   ;;  %s3264_s1 = inlined_call_operand.vmem [shape: bf16[32,256], index: 1, kind: input, shape index: {}]   ;;  %s3265_s2 = inlined_call_operand.vmem [shape: f32[1,256], index: 2, kind: input, shape index: {}]   ;;  %s3266_s3 = inlined_call_operand.vmem [shape: bf16[256,128], index: 3, kind: input, shape index: {}]   ;;  %s3267_s4 = inlined_call_operand.vmem [shape: f32[1,128], index: 4, kind: input, shape index: {}]   ;;  %s3268_s5 = inlined_call_operand.vmem [shape: bf16[128,64], index: 5, kind: input, shape index: {}]   ;;  %s3269_s6 = inlined_call_operand.vmem [shape: f32[1,64], index: 6, kind: input, shape index: {}]   ;;  %s3270_s7 = inlined_call_operand.vmem [shape: bf16[64,32], index: 7, kind: input, shape index: {}]   ;;  %s3271_s8 = inlined_call_operand.vmem [shape: f32[1,32], index: 8, kind: input, shape index: {}]   ;;  %s3272_s9 = inlined_call_operand.vmem [shape: f32[1,32], index: 9, kind: input, shape index: {}]   ;;  %s3273_s10 = inlined_call_operand.<no memory space> [shape: f32[1,1], index: 10, kind: input, shape index: {}]   ;;  %s3274_s11 = inlined_call_operand.vmem [shape: f32[512,1], index: 11, kind: output, shape index: {}]  }
   0x1   :  { %v16_v0 = vstv %s3273_s10 }
   0x2   :  { %17 = vst [vmem:[#allocation2] sm:$0x1] %v16_v0 }
   0x3 LB: > { %s2204_s20 = sadd.s32 4294967295, %s2534_s19   ;;  %p2208_p0 = scmp.ge.s32.totalorder %s2534_s19, 1  ;;  %s2534_s19 = sphi %s2599_s19, %s23_s19  }
   0x4   : > { %p340_p1 = scmp.lt.s32.totalorder %s2534_s19, 3 }
   0x6   : > { %p341_p2 = pnand %p2208_p0, %p340_p1 }
   0x7   : > { %s2209_s17 = sshll.u32 (!%p341_p2), %s2204_s20, 5 }
   0x8   : > { %344 = sbr.rel (%p341_p2) target bundleno = 961 (0x3c1), region = 64  ;;  %p381_p3 = scmp.lt.s32.totalorder (!%p341_p2), %s2209_s17, 63 }
   0xd   : > { %v2287_v1 = vld [vmem:[%s3264_s1 + $0x10] sm:$0xf]  ;;  %v2474_v2 = vld [vmem:[%s3264_s1 + $0x14] sm:$0xf0]  ;;  %v2473_v3 = vld [vmem:[%s3264_s1 + $0x14] sm:$0xf] }
   0xe   : > { %v2288_v4 = vor.u32 %v2474_v2, %v2287_v1  ;;  %v2289_v5 = vld [vmem:[%s3264_s1 + $0x18] sm:$0xf0]  ;;  %v2279_v6 = vld [vmem:[%s3264_s1] sm:$0xf]  ;;  %v2472_v7 = vld [vmem:[%s3264_s1 + $0x4] sm:$0xf0] }
   0xf   : > { %v2292_v8 = vor.u32 %v2473_v3, %v2289_v5  ;;  %v2471_v9 = vld [vmem:[%s3264_s1 + $0x4] sm:$0xf]  ;;  %v2281_v10 = vld [vmem:[%s3264_s1 + $0x8] sm:$0xf0]  ;;  %v2280_v11 = vor.u32 %v2472_v7, %v2279_v6  ;;  %v2490_v12 = vld [vmem:[%s3266_s3 + $0x78] sm:$0xff]  ;;  %s3276_s17 = smov (!%p381_p3, %s2209_s17), 63 }
  0x10   : > { %590 = vmatpush.bf16.msra.mxu0 %v2288_v4  ;;  %2503 = vmatpush.bf16.msra.mxu2 %v2288_v4  ;;  %v2284_v13 = vor.u32 %v2471_v9, %v2281_v10  ;;  %v2482_v14 = vld [vmem:[%s3266_s3 + $0x38] sm:$0xff]  ;;  %s2210_s20 = sshll.u32 %s3276_s17, 2  ;;  %vm535_vm0 = vcmask 261120   ;;  %v2489_v17 = vld [vmem:[%s3266_s3 + $0x70] sm:$0xff]  ;;  %v2488_v20 = vld [vmem:[%s3266_s3 + $0x68] sm:$0xff]  ;;  %s2212_s16 = sshll.u32 %s3276_s17, 3 }
  0x11   : > { %679 = vmatpush.bf16.msra.mxu1 %v2292_v8  ;;  %2505 = vmatpush.bf16.msra.mxu3 %v2292_v8  ;;  %s2643_s25 = scalar_lea.vmem %s3263_s0, %s2210_s20  ;;  %v2481_v19 = vld [vmem:[%s3266_s3 + $0x30] sm:$0xff]  ;;  %v2480_v23 = vld [vmem:[%s3266_s3 + $0x28] sm:$0xff]  ;;  %v2487_v24 = vld [vmem:[%s3266_s3 + $0x60] sm:$0xff]  ;;  %s3112_s22 = scalar_lea.vmem %s3274_s11, %s2212_s16 }
  0x12   : > { %v2455_v15 = vld [vmem:[%s2643_s25] sm:$0xff]  ;;  %v2464_v18 = vld [vmem:[%s2643_s25 + $0x48] sm:$0xff]  ;;  %v2465_v22 = vld [vmem:[%s2643_s25 + $0x50] sm:$0xff] }
  0x13   : > { %v2647_v16 = vld [vmem:[%s2643_s25 + $0x40] sm:$0xff]  ;;  %v2456_v21 = vld [vmem:[%s2643_s25 + $0x8] sm:$0xff]  ;;  %v2457_v25 = vld [vmem:[%s2643_s25 + $0x10] sm:$0xff] }
  0x14   : > { %591 = vmatpush.bf16.msra.mxu0 %v2280_v11  ;;  %2504 = vmatpush.bf16.msra.mxu2 %v2280_v11  ;;  %v2466_v26 = vld [vmem:[%s2643_s25 + $0x58] sm:$0xff]  ;;  %v2479_v27 = vld [vmem:[%s3266_s3 + $0x20] sm:$0xff]  ;;  %v2485_v32 = vld [vmem:[%s3266_s3 + $0x50] sm:$0xff] }
  0x15   : > { %680 = vmatpush.bf16.msra.mxu1 %v2284_v13  ;;  %2506 = vmatpush.bf16.msra.mxu3 %v2284_v13  ;;  %v2486_v28 = vld [vmem:[%s3266_s3 + $0x58] sm:$0xff]  ;;  %v2467_v30 = vld [vmem:[%s2643_s25 + $0x60] sm:$0xff]  ;;  %v2468_v34 = vld [vmem:[%s2643_s25 + $0x68] sm:$0xff] }
  0x16   : > { %v2458_v29 = vld [vmem:[%s2643_s25 + $0x18] sm:$0xff]  ;;  %v2459_v33 = vld [vmem:[%s2643_s25 + $0x20] sm:$0xff]  ;;  %v2477_v35 = vld [vmem:[%s3266_s3 + $0x10] sm:$0xff] }
  0x17   : > { %2293 = vmatmul.msk.bf16.vlgmr.msra.gmra.mxu0 %vm535_vm0, %v2455_v15  ;;  %2302 = vmatmul.msk.bf16.vlgmr.msra.gmra.mxu2 %vm535_vm0, %v2464_v18  ;;  %v2478_v31 = vld [vmem:[%s3266_s3 + $0x18] sm:$0xff]  ;;  %v2484_v36 = vld [vmem:[%s3266_s3 + $0x48] sm:$0xff]  ;;  %v2469_v38 = vld [vmem:[%s2643_s25 + $0x70] sm:$0xff] }
  0x18   : > { %1118 = vmatpush.bf16.msrb.mxu2 %v2482_v14  ;;  %2309 = vmatmul.msk.bf16.vlgmr.msra.gmra.mxu1 %vm535_vm0, %v2455_v15  ;;  %v2460_v37 = vld [vmem:[%s2643_s25 + $0x28] sm:$0xff]  ;;  %v2461_v40 = vld [vmem:[%s2643_s25 + $0x30] sm:$0xff]  ;;  %v2470_v41 = vld [vmem:[%s2643_s25 + $0x78] sm:$0xff] }
  0x19   : > { %1207 = vmatpush.bf16.msrb.mxu3 %v2490_v12  ;;  %v2476_v39 = vld [vmem:[%s3266_s3 + $0x8] sm:$0xff]  ;;  %v2475_v42 = vld [vmem:[%s3266_s3] sm:$0xff]  ;;  %v2462_v44 = vld [vmem:[%s2643_s25 + $0x38] sm:$0xff] }
  0x1a   : > { %2317 = vmatmul.msk.bf16.vlgmr.msra.gmra.mxu3 %vm535_vm0, %v2647_v16  ;;  %v2483_v43 = vld [vmem:[%s3266_s3 + $0x40] sm:$0xff]  ;;  %v2498_v45 = vld [vmem:[%s3268_s5 + $0x38] sm:$0xff]  ;;  %v2497_v0 = vld [vmem:[%s3268_s5 + $0x30] sm:$0xff] }
  0x1b   : > { %1476 = vmatpush.bf16.msrb.mxu0 %v2498_v45  ;;  %v429_v46 = vld [vmem:[%s3265_s2] sm:$0x3] }
  0x1c   : > { %1119 = vmatpush.bf16.msrb.mxu2 %v2481_v19  ;;  %v2743_v49 = vperm.slane %v429_v46, 0  ;;  %v2745_v50 = vperm.slane %v429_v46, 1 }
  0x1d   : > { %1208 = vmatpush.bf16.msrb.mxu3 %v2489_v17 }
  0x1f   : > { %1477 = vmatpush.bf16.msrb.mxu0 %v2497_v0 }
  0x20   : > { %1120 = vmatpush.bf16.msrb.mxu2 %v2480_v23 }
  0x21   : > { %1209 = vmatpush.bf16.msrb.mxu3 %v2488_v20 }
  0x24   : > { %1121 = vmatpush.bf16.msrb.mxu2 %v2479_v27 }
  0x25   : > { %1210 = vmatpush.bf16.msrb.mxu3 %v2487_v24 }
  0x27   : > { %2294 = vmatmul.msk.bf16.gmra.mxu0 %vm535_vm0, %v2456_v21  ;;  %2303 = vmatmul.msk.bf16.gmra.mxu2 %vm535_vm0, %v2465_v22 }
  0x28   : > { %2310 = vmatmul.msk.bf16.gmra.mxu1 %vm535_vm0, %v2456_v21  ;;  %1122 = vmatpush.bf16.msrb.mxu2 %v2478_v31 }
  0x29   : > { %1211 = vmatpush.bf16.msrb.mxu3 %v2486_v28 }
  0x2a   : > { %2318 = vmatmul.msk.bf16.gmra.mxu3 %vm535_vm0, %v2464_v18 }
  0x2c   : > { %1123 = vmatpush.bf16.msrb.mxu2 %v2477_v35 }
  0x2d   : > { %1212 = vmatpush.bf16.msrb.mxu3 %v2485_v32 }
  0x30   : > { %1124 = vmatpush.bf16.msrb.mxu2 %v2476_v39 }
  0x31   : > { %1213 = vmatpush.bf16.msrb.mxu3 %v2484_v36 }
  0x34   : > { %1125 = vmatpush.bf16.msrb.mxu2 %v2475_v42 }
  0x35   : > { %1214 = vmatpush.bf16.msrb.mxu3 %v2483_v43 }
  0x37   : > { %2295 = vmatmul.msk.bf16.gmra.mxu0 %vm535_vm0, %v2457_v25  ;;  %2304 = vmatmul.msk.bf16.gmra.mxu2 %vm535_vm0, %v2466_v26 }
  0x38   : > { %2311 = vmatmul.msk.bf16.gmra.mxu1 %vm535_vm0, %v2457_v25  ;;  %2507 = vmatpush.bf16.msra.mxu2 %v2498_v45 }
  0x3a   : > { %2319 = vmatmul.msk.bf16.gmra.mxu3 %vm535_vm0, %v2465_v22 }
  0x3c   : > { %2508 = vmatpush.bf16.msra.mxu2 %v2497_v0 }
  0x47   : > { %2296 = vmatmul.msk.bf16.gmra.mxu0 %vm535_vm0, %v2458_v29  ;;  %2305 = vmatmul.msk.bf16.gmra.mxu2 %vm535_vm0, %v2467_v30 }
  0x48   : > { %2312 = vmatmul.msk.bf16.gmra.mxu1 %vm535_vm0, %v2458_v29  ;;  %v2496_v29 = vld [vmem:[%s3268_s5 + $0x28] sm:$0xff] }
  0x49   : > { %1478 = vmatpush.bf16.msrb.mxu0 %v2496_v29  ;;  %2509 = vmatpush.bf16.msra.mxu2 %v2496_v29 }
  0x4a   : > { %2320 = vmatmul.msk.bf16.gmra.mxu3 %vm535_vm0, %v2466_v26 }
  0x57   : > { %2297 = vmatmul.msk.bf16.gmra.mxu0 %vm535_vm0, %v2459_v33  ;;  %2306 = vmatmul.msk.bf16.gmra.mxu2 %vm535_vm0, %v2468_v34 }
  0x58   : > { %2313 = vmatmul.msk.bf16.gmra.mxu1 %vm535_vm0, %v2459_v33 }
  0x5a   : > { %2321 = vmatmul.msk.bf16.gmra.mxu3 %vm535_vm0, %v2467_v30 }
  0x67   : > { %2298 = vmatmul.msk.bf16.gmra.mxu0 %vm535_vm0, %v2460_v37  ;;  %2307 = vmatmul.msk.bf16.gmra.mxu2 %vm535_vm0, %v2469_v38 }
  0x68   : > { %2314 = vmatmul.msk.bf16.gmra.mxu1 %vm535_vm0, %v2460_v37 }
  0x6a   : > { %2322 = vmatmul.msk.bf16.gmra.mxu3 %vm535_vm0, %v2468_v34 }
  0x77   : > { %2299 = vmatmul.msk.bf16.gmra.mxu0 %vm535_vm0, %v2461_v40  ;;  %2308 = vmatmul.msk.bf16.gmra.mxu2 %vm535_vm0, %v2470_v41 }
  0x78   : > { %2315 = vmatmul.msk.bf16.gmra.mxu1 %vm535_vm0, %v2461_v40 }
  0x7a   : > { %2323 = vmatmul.msk.bf16.gmra.mxu3 %vm535_vm0, %v2469_v38 }
  0x87   : > { %2300 = vmatmul.msk.bf16.gmra.mxu0 %vm535_vm0, %v2462_v44 }
  0x88   : > { %2316 = vmatmul.msk.bf16.gmra.mxu1 %vm535_vm0, %v2462_v44 }
  0x8a   : > { %2324 = vmatmul.msk.bf16.gmra.mxu3 %vm535_vm0, %v2470_v41 }
  0x94   : > { %v593_v47 = vpop.f32.mrf.mxu0 }
  0x95   : > { %v682_v48 = vpop.f32.mrf.mxu1  ;;  %v594_v51 = vadd.f32 %v593_v47, %v2743_v49 }
  0x96   : > { %v683_v52 = vadd.f32 %v682_v48, %v2745_v50 }
  0x97   : > { %2301 = vmatmul.msk.bf16.gmra.mxu0 %vm535_vm0, %v2647_v16  ;;  %v826_v56 = vmul.f32 0.2, %v594_v51  ;;  %vm762_vm1 = vcmp.ge.f32.partialorder %v594_v51, 0.0 }
  0x98   : > { %v827_v57 = vmul.f32 0.2, %v683_v52  ;;  %vm763_vm2 = vcmp.ge.f32.partialorder %v683_v52, 0.0 }
  0x99   : > { %v890_v1 = vsel %vm762_vm1, %v594_v51, %v826_v56 }
  0x9a   : > { %v2753_v60 = vpop.f32.mrf.mxu2  ;;  %v891_v3 = vsel %vm763_vm2, %v683_v52, %v827_v57 }
  0x9c   : > { %v595_v54 = vpop.f32.mrf.mxu0 }
  0x9d   : > { %v722_v53 = vpop.f32.mrf.mxu3  ;;  %v684_v55 = vpop.f32.mrf.mxu1  ;;  %v596_v58 = vadd.f32 %v595_v54, %v2743_v49 }
  0x9e   : > { %v685_v59 = vadd.f32 %v684_v55, %v2745_v50  ;;  %v723_v61 = vadd.f32 %v722_v53, %v2745_v50 }
  0x9f   : > { %vm764_vm3 = vcmp.ge.f32.partialorder %v596_v58, 0.0  ;;  %v828_v62 = vmul.f32 0.2, %v596_v58 }
  0xa0   : > { %vm765_vm4 = vcmp.ge.f32.partialorder %v685_v59, 0.0  ;;  %v829_v63 = vmul.f32 0.2, %v685_v59  ;;  %v859_v5 = vmul.f32 0.2, %v723_v61  ;;  %vm795_vm5 = vcmp.ge.f32.partialorder %v723_v61, 0.0 }
  0xa1   : > { %v892_v2 = vsel %vm764_vm3, %v596_v58, %v828_v62 }
  0xa2   : > { %v893_v4 = vsel %vm765_vm4, %v685_v59, %v829_v63  ;;  %v954_v6 = vpack.c.bf16 %v892_v2, %v890_v1  ;;  %v2760_v13 = vsel %vm795_vm5, %v723_v61, %v859_v5  ;;  %v2762_v14 = vpop.f32.mrf.mxu2 }
  0xa3   : > { %v955_v7 = vpack.c.bf16 %v893_v4, %v891_v3 }
  0xa4   : > { %v598_v9 = vpop.f32.mrf.mxu0  ;;  %1126 = vmatmul.bf16.vlgmr.msrb.gmra.mxu2 %v954_v6 }
  0xa5   : > { %v724_v8 = vpop.f32.mrf.mxu3  ;;  %v687_v10 = vpop.f32.mrf.mxu1  ;;  %1215 = vmatmul.bf16.vlgmr.msrb.gmra.mxu3 %v955_v7  ;;  %v599_v16 = vadd.f32 %v598_v9, %v2743_v49 }
  0xa6   : > { %v725_v11 = vadd.f32 %v724_v8, %v2745_v50  ;;  %v688_v17 = vadd.f32 %v687_v10, %v2745_v50 }
  0xa7   : > { %v830_v22 = vmul.f32 0.2, %v599_v16  ;;  %vm766_vm7 = vcmp.ge.f32.partialorder %v599_v16, 0.0 }
  0xa8   : > { %vm797_vm6 = vcmp.ge.f32.partialorder %v725_v11, 0.0  ;;  %v861_v12 = vmul.f32 0.2, %v725_v11  ;;  %v831_v23 = vmul.f32 0.2, %v688_v17  ;;  %vm767_vm8 = vcmp.ge.f32.partialorder %v688_v17, 0.0 }
  0xa9   : > { %v894_v30 = vsel %vm766_vm7, %v599_v16, %v830_v22 }
  0xaa   : > { %v2764_v15 = vsel %vm797_vm6, %v725_v11, %v861_v12  ;;  %v895_v32 = vsel %vm767_vm8, %v688_v17, %v831_v23  ;;  %v2776_v34 = vpop.f32.mrf.mxu2  ;;  %v2495_v12 = vld [vmem:[%s3268_s5 + $0x20] sm:$0xff] }
  0xab   : > { %v971_v18 = vpack.c.bf16 %v2764_v15, %v2760_v13  ;;  %1479 = vmatpush.bf16.msrb.mxu0 %v2495_v12  ;;  %2510 = vmatpush.bf16.msra.mxu2 %v2495_v12  ;;  %v2502_v13 = vld [vmem:[%s3270_s7 + $0x18] sm:$0xff] }
  0xac   : > { %v600_v20 = vpop.f32.mrf.mxu0  ;;  %1766 = vmatpush.bf16.msrb.mxu1 %v2502_v13 }
  0xad   : > { %v727_v19 = vpop.f32.mrf.mxu3  ;;  %v689_v21 = vpop.f32.mrf.mxu1  ;;  %v601_v24 = vadd.f32 %v600_v20, %v2743_v49 }
  0xae   : > { %v690_v25 = vadd.f32 %v689_v21, %v2745_v50  ;;  %v728_v26 = vadd.f32 %v727_v19, %v2745_v50 }
  0xaf   : > { %v832_v27 = vmul.f32 0.2, %v601_v24  ;;  %vm768_vm9 = vcmp.ge.f32.partialorder %v601_v24, 0.0 }
  0xb0   : > { %v833_v28 = vmul.f32 0.2, %v690_v25  ;;  %vm769_vm10 = vcmp.ge.f32.partialorder %v690_v25, 0.0  ;;  %v863_v35 = vmul.f32 0.2, %v728_v26  ;;  %vm799_vm11 = vcmp.ge.f32.partialorder %v728_v26, 0.0 }
  0xb1   : > { %v896_v31 = vsel %vm768_vm9, %v601_v24, %v832_v27 }
  0xb2   : > { %v897_v33 = vsel %vm769_vm10, %v690_v25, %v833_v28  ;;  %v956_v36 = vpack.c.bf16 %v896_v31, %v894_v30  ;;  %v2779_v43 = vsel %vm799_vm11, %v728_v26, %v863_v35  ;;  %v2787_v51 = vpop.f32.mrf.mxu2 }
  0xb3   : > { %v957_v37 = vpack.c.bf16 %v897_v33, %v895_v32 }
  0xb4   : > { %v603_v39 = vpop.f32.mrf.mxu0  ;;  %1131 = vmatmul.bf16.gmra.mxu2 %v956_v36 }
  0xb5   : > { %v729_v38 = vpop.f32.mrf.mxu3  ;;  %v692_v40 = vpop.f32.mrf.mxu1  ;;  %1220 = vmatmul.bf16.gmra.mxu3 %v957_v37  ;;  %v604_v45 = vadd.f32 %v603_v39, %v2743_v49 }
  0xb6   : > { %v730_v41 = vadd.f32 %v729_v38, %v2745_v50  ;;  %v693_v46 = vadd.f32 %v692_v40, %v2745_v50 }
  0xb7   : > { %v834_v54 = vmul.f32 0.2, %v604_v45  ;;  %vm770_vm13 = vcmp.ge.f32.partialorder %v604_v45, 0.0 }
  0xb8   : > { %vm801_vm12 = vcmp.ge.f32.partialorder %v730_v41, 0.0  ;;  %v865_v42 = vmul.f32 0.2, %v730_v41  ;;  %v835_v55 = vmul.f32 0.2, %v693_v46  ;;  %vm771_vm14 = vcmp.ge.f32.partialorder %v693_v46, 0.0 }
  0xb9   : > { %v898_v62 = vsel %vm770_vm13, %v604_v45, %v834_v54 }
  0xba   : > { %v2781_v44 = vsel %vm801_vm12, %v730_v41, %v865_v42  ;;  %v899_v0 = vsel %vm771_vm14, %v693_v46, %v835_v55  ;;  %v2793_v9 = vpop.f32.mrf.mxu2 }
  0xbb   : > { %v973_v47 = vpack.c.bf16 %v2781_v44, %v2779_v43 }
  0xbc   : > { %v605_v52 = vpop.f32.mrf.mxu0 }
  0xbd   : > { %v732_v48 = vpop.f32.mrf.mxu3  ;;  %v694_v53 = vpop.f32.mrf.mxu1  ;;  %v606_v56 = vadd.f32 %v605_v52, %v2743_v49  ;;  %v2494_v52 = vld [vmem:[%s3268_s5 + $0x18] sm:$0xff] }
  0xbe   : > { %v695_v57 = vadd.f32 %v694_v53, %v2745_v50  ;;  %v733_v58 = vadd.f32 %v732_v48, %v2745_v50  ;;  %1480 = vmatpush.bf16.msrb.mxu0 %v2494_v52  ;;  %2511 = vmatpush.bf16.msra.mxu2 %v2494_v52 }
  0xbf   : > { %v836_v59 = vmul.f32 0.2, %v606_v56  ;;  %vm772_vm15 = vcmp.ge.f32.partialorder %v606_v56, 0.0 }
  0xc0   : > { %v837_v61 = vmul.f32 0.2, %v695_v57  ;;  %vm773_vm1 = vcmp.ge.f32.partialorder %v695_v57, 0.0  ;;  %v867_v2 = vmul.f32 0.2, %v733_v58  ;;  %vm803_vm2 = vcmp.ge.f32.partialorder %v733_v58, 0.0 }
  0xc1   : > { %v900_v63 = vsel %vm772_vm15, %v606_v56, %v836_v59 }
  0xc2   : > { %v901_v1 = vsel %vm773_vm1, %v695_v57, %v837_v61  ;;  %v958_v3 = vpack.c.bf16 %v900_v63, %v898_v62  ;;  %v2795_v11 = vsel %vm803_vm2, %v733_v58, %v867_v2  ;;  %v2809_v31 = vpop.f32.mrf.mxu2 }
  0xc3   : > { %v959_v4 = vpack.c.bf16 %v901_v1, %v899_v0  ;;  %v651_v13 = vadd.f32 %v2809_v31, %v2743_v49 }
  0xc4   : > { %v608_v6 = vpop.f32.mrf.mxu0  ;;  %1136 = vmatmul.bf16.gmra.mxu2 %v958_v3 }
  0xc5   : > { %v734_v5 = vpop.f32.mrf.mxu3  ;;  %v697_v7 = vpop.f32.mrf.mxu1  ;;  %1225 = vmatmul.bf16.gmra.mxu3 %v959_v4  ;;  %v609_v17 = vadd.f32 %v608_v6, %v2743_v49 }
  0xc6   : > { %v735_v8 = vadd.f32 %v734_v5, %v2745_v50  ;;  %v698_v19 = vadd.f32 %v697_v7, %v2745_v50 }
  0xc7   : > { %v838_v24 = vmul.f32 0.2, %v609_v17  ;;  %vm774_vm4 = vcmp.ge.f32.partialorder %v609_v17, 0.0 }
  0xc8   : > { %vm805_vm3 = vcmp.ge.f32.partialorder %v735_v8, 0.0  ;;  %v869_v10 = vmul.f32 0.2, %v735_v8  ;;  %v839_v25 = vmul.f32 0.2, %v698_v19  ;;  %vm775_vm5 = vcmp.ge.f32.partialorder %v698_v19, 0.0 }
  0xc9   : > { %v902_v32 = vsel %vm774_vm4, %v609_v17, %v838_v24 }
  0xca   : > { %v2800_v16 = vsel %vm805_vm3, %v735_v8, %v869_v10  ;;  %v903_v35 = vsel %vm775_vm5, %v698_v19, %v839_v25  ;;  %v2821_v56 = vpop.f32.mrf.mxu2 }
  0xcb   : > { %v975_v20 = vpack.c.bf16 %v2800_v16, %v2795_v11  ;;  %v2501_v11 = vld [vmem:[%s3270_s7 + $0x10] sm:$0xff] }
  0xcc   : > { %v610_v22 = vpop.f32.mrf.mxu0  ;;  %1767 = vmatpush.bf16.msrb.mxu1 %v2501_v11 }
  0xcd   : > { %v737_v21 = vpop.f32.mrf.mxu3  ;;  %v699_v23 = vpop.f32.mrf.mxu1  ;;  %v611_v26 = vadd.f32 %v610_v22, %v2743_v49 }
  0xce   : > { %v700_v27 = vadd.f32 %v699_v23, %v2745_v50  ;;  %v738_v28 = vadd.f32 %v737_v21, %v2745_v50 }
  0xcf   : > { %v840_v29 = vmul.f32 0.2, %v611_v26  ;;  %vm776_vm6 = vcmp.ge.f32.partialorder %v611_v26, 0.0 }
  0xd0   : > { %v841_v30 = vmul.f32 0.2, %v700_v27  ;;  %vm777_vm7 = vcmp.ge.f32.partialorder %v700_v27, 0.0  ;;  %v871_v37 = vmul.f32 0.2, %v738_v28  ;;  %vm807_vm8 = vcmp.ge.f32.partialorder %v738_v28, 0.0 }
  0xd1   : > { %v904_v33 = vsel %vm776_vm6, %v611_v26, %v840_v29 }
  0xd2   : > { %v905_v36 = vsel %vm777_vm7, %v700_v27, %v841_v30  ;;  %v960_v38 = vpack.c.bf16 %v904_v33, %v902_v32  ;;  %v2812_v48 = vsel %vm807_vm8, %v738_v28, %v871_v37  ;;  %v2828_v19 = vpop.f32.mrf.mxu2  ;;  %v2493_v27 = vld [vmem:[%s3268_s5 + $0x10] sm:$0xff] }
  0xd3   : > { %v961_v39 = vpack.c.bf16 %v905_v36, %v903_v35  ;;  %1481 = vmatpush.bf16.msrb.mxu0 %v2493_v27  ;;  %2512 = vmatpush.bf16.msra.mxu2 %v2493_v27 }
  0xd4   : > { %v613_v41 = vpop.f32.mrf.mxu0  ;;  %1141 = vmatmul.bf16.gmra.mxu2 %v960_v38 }
  0xd5   : > { %v739_v40 = vpop.f32.mrf.mxu3  ;;  %v702_v42 = vpop.f32.mrf.mxu1  ;;  %1230 = vmatmul.bf16.gmra.mxu3 %v961_v39  ;;  %v614_v54 = vadd.f32 %v613_v41, %v2743_v49 }
  0xd6   : > { %v740_v45 = vadd.f32 %v739_v40, %v2745_v50  ;;  %v703_v55 = vadd.f32 %v702_v42, %v2745_v50 }
  0xd7   : > { %v842_v62 = vmul.f32 0.2, %v614_v54  ;;  %vm778_vm11 = vcmp.ge.f32.partialorder %v614_v54, 0.0 }
  0xd8   : > { %vm809_vm9 = vcmp.ge.f32.partialorder %v740_v45, 0.0  ;;  %v873_v46 = vmul.f32 0.2, %v740_v45  ;;  %v843_v63 = vmul.f32 0.2, %v703_v55  ;;  %vm779_vm10 = vcmp.ge.f32.partialorder %v703_v55, 0.0 }
  0xd9   : > { %v906_v5 = vsel %vm778_vm11, %v614_v54, %v842_v62 }
  0xda   : > { %v2817_v53 = vsel %vm809_vm9, %v740_v45, %v873_v46  ;;  %v907_v7 = vsel %vm779_vm10, %v703_v55, %v843_v63  ;;  %v2844_v41 = vpop.f32.mrf.mxu2 }
  0xdb   : > { %v977_v57 = vpack.c.bf16 %v2817_v53, %v2812_v48 }
  0xdc   : > { %v615_v59 = vpop.f32.mrf.mxu0 }
  0xdd   : > { %v742_v58 = vpop.f32.mrf.mxu3  ;;  %v704_v61 = vpop.f32.mrf.mxu1  ;;  %v616_v0 = vadd.f32 %v615_v59, %v2743_v49 }
  0xde   : > { %v705_v1 = vadd.f32 %v704_v61, %v2745_v50  ;;  %v743_v2 = vadd.f32 %v742_v58, %v2745_v50 }
  0xdf   : > { %v844_v3 = vmul.f32 0.2, %v616_v0  ;;  %vm780_vm13 = vcmp.ge.f32.partialorder %v616_v0, 0.0 }
  0xe0   : > { %vm781_vm12 = vcmp.ge.f32.partialorder %v705_v1, 0.0  ;;  %v845_v4 = vmul.f32 0.2, %v705_v1  ;;  %v875_v10 = vmul.f32 0.2, %v743_v2  ;;  %vm811_vm14 = vcmp.ge.f32.partialorder %v743_v2, 0.0 }
  0xe1   : > { %v908_v6 = vsel %vm780_vm13, %v616_v0, %v844_v3 }
  0xe2   : > { %v909_v8 = vsel %vm781_vm12, %v705_v1, %v845_v4  ;;  %v962_v12 = vpack.c.bf16 %v908_v6, %v906_v5  ;;  %v2831_v26 = vsel %vm811_vm14, %v743_v2, %v875_v10  ;;  %v2850_v5 = vpop.f32.mrf.mxu2  ;;  %v2492_v6 = vld [vmem:[%s3268_s5 + $0x8] sm:$0xff] }
  0xe3   : > { %v963_v17 = vpack.c.bf16 %v909_v8, %v907_v7  ;;  %1482 = vmatpush.bf16.msrb.mxu0 %v2492_v6  ;;  %2513 = vmatpush.bf16.msra.mxu2 %v2492_v6 }
  0xe4   : > { %v618_v22 = vpop.f32.mrf.mxu0  ;;  %1146 = vmatmul.bf16.gmra.mxu2 %v962_v12 }
  0xe5   : > { %v744_v21 = vpop.f32.mrf.mxu3  ;;  %v707_v23 = vpop.f32.mrf.mxu1  ;;  %1235 = vmatmul.bf16.gmra.mxu3 %v963_v17  ;;  %v619_v29 = vadd.f32 %v618_v22, %v2743_v49 }
  0xe6   : > { %v745_v24 = vadd.f32 %v744_v21, %v2745_v50  ;;  %v708_v30 = vadd.f32 %v707_v23, %v2745_v50 }
  0xe7   : > { %v846_v37 = vmul.f32 0.2, %v619_v29  ;;  %vm782_vm1 = vcmp.ge.f32.partialorder %v619_v29, 0.0 }
  0xe8   : > { %vm813_vm15 = vcmp.ge.f32.partialorder %v745_v24, 0.0  ;;  %v877_v25 = vmul.f32 0.2, %v745_v24  ;;  %v847_v38 = vmul.f32 0.2, %v708_v30  ;;  %vm783_vm2 = vcmp.ge.f32.partialorder %v708_v30, 0.0 }
  0xe9   : > { %v910_v52 = vsel %vm782_vm1, %v619_v29, %v846_v37 }
  0xea   : > { %v2836_v28 = vsel %vm813_vm15, %v745_v24, %v877_v25  ;;  %v911_v55 = vsel %vm783_vm2, %v708_v30, %v847_v38 }
  0xeb   : > { %v979_v32 = vpack.c.bf16 %v2836_v28, %v2831_v26  ;;  %v2500_v26 = vld [vmem:[%s3270_s7 + $0x8] sm:$0xff] }
  0xec   : > { %v620_v35 = vpop.f32.mrf.mxu0  ;;  %1768 = vmatpush.bf16.msrb.mxu1 %v2500_v26 }
  0xed   : > { %v747_v33 = vpop.f32.mrf.mxu3  ;;  %v709_v36 = vpop.f32.mrf.mxu1  ;;  %v621_v39 = vadd.f32 %v620_v35, %v2743_v49 }
  0xee   : > { %v710_v40 = vadd.f32 %v709_v36, %v2745_v50  ;;  %v748_v42 = vadd.f32 %v747_v33, %v2745_v50  ;;  %v2864_v35 = vpop.f32.mrf.mxu2 }
  0xef   : > { %vm784_vm3 = vcmp.ge.f32.partialorder %v621_v39, 0.0  ;;  %v848_v45 = vmul.f32 0.2, %v621_v39 }
  0xf0   : > { %vm785_vm4 = vcmp.ge.f32.partialorder %v710_v40, 0.0  ;;  %v849_v46 = vmul.f32 0.2, %v710_v40  ;;  %v879_v59 = vmul.f32 0.2, %v748_v42  ;;  %vm815_vm5 = vcmp.ge.f32.partialorder %v748_v42, 0.0 }
  0xf1   : > { %v912_v54 = vsel %vm784_vm3, %v621_v39, %v848_v45 }
  0xf2   : > { %v913_v58 = vsel %vm785_vm4, %v710_v40, %v849_v46  ;;  %v964_v61 = vpack.c.bf16 %v912_v54, %v910_v52  ;;  %v2848_v4 = vsel %vm815_vm5, %v748_v42, %v879_v59 }
  0xf3   : > { %v965_v62 = vpack.c.bf16 %v913_v58, %v911_v55 }
  0xf4   : > { %v623_v0 = vpop.f32.mrf.mxu0  ;;  %1151 = vmatmul.bf16.gmra.mxu2 %v964_v61 }
  0xf5   : > { %v749_v63 = vpop.f32.mrf.mxu3  ;;  %v712_v1 = vpop.f32.mrf.mxu1  ;;  %1240 = vmatmul.bf16.gmra.mxu3 %v965_v62  ;;  %v624_v8 = vadd.f32 %v623_v0, %v2743_v49 }
  0xf6   : > { %v750_v2 = vadd.f32 %v749_v63, %v2745_v50  ;;  %v713_v10 = vadd.f32 %v712_v1, %v2745_v50  ;;  %v2875_v1 = vpop.f32.mrf.mxu2 }
  0xf7   : > { %v850_v23 = vmul.f32 0.2, %v624_v8  ;;  %vm786_vm7 = vcmp.ge.f32.partialorder %v624_v8, 0.0 }
  0xf8   : > { %vm817_vm6 = vcmp.ge.f32.partialorder %v750_v2, 0.0  ;;  %v881_v3 = vmul.f32 0.2, %v750_v2  ;;  %v851_v24 = vmul.f32 0.2, %v713_v10  ;;  %vm787_vm8 = vcmp.ge.f32.partialorder %v713_v10, 0.0 }
  0xf9   : > { %v914_v36 = vsel %vm786_vm7, %v624_v8, %v850_v23  ;;  %v2491_v8 = vld [vmem:[%s3268_s5] sm:$0xff] }
  0xfa   : > { %v2855_v7 = vsel %vm817_vm6, %v750_v2, %v881_v3  ;;  %v915_v38 = vsel %vm787_vm8, %v713_v10, %v851_v24  ;;  %1483 = vmatpush.bf16.msrb.mxu0 %v2491_v8  ;;  %2514 = vmatpush.bf16.msra.mxu2 %v2491_v8 }
  0xfb   : > { %v981_v12 = vpack.c.bf16 %v2855_v7, %v2848_v4 }
  0xfc   : > { %v625_v21 = vpop.f32.mrf.mxu0 }
  0xfd   : > { %v752_v17 = vpop.f32.mrf.mxu3  ;;  %v714_v22 = vpop.f32.mrf.mxu1  ;;  %v626_v25 = vadd.f32 %v625_v21, %v2743_v49 }
  0xfe   : > { %v715_v27 = vadd.f32 %v714_v22, %v2745_v50  ;;  %v753_v29 = vadd.f32 %v752_v17, %v2745_v50 }
  0xff   : > { %vm788_vm9 = vcmp.ge.f32.partialorder %v626_v25, 0.0  ;;  %v852_v30 = vmul.f32 0.2, %v626_v25 }
 0x100   : > { %vm789_vm10 = vcmp.ge.f32.partialorder %v715_v27, 0.0  ;;  %v853_v33 = vmul.f32 0.2, %v715_v27  ;;  %v883_v40 = vmul.f32 0.2, %v753_v29  ;;  %vm819_vm11 = vcmp.ge.f32.partialorder %v753_v29, 0.0 }
 0x101   : > { %v916_v37 = vsel %vm788_vm9, %v626_v25, %v852_v30 }
 0x102   : > { %v917_v39 = vsel %vm789_vm10, %v715_v27, %v853_v33  ;;  %v966_v42 = vpack.c.bf16 %v916_v37, %v914_v36  ;;  %v2867_v59 = vsel %vm819_vm11, %v753_v29, %v883_v40 }
 0x103   : > { %v967_v45 = vpack.c.bf16 %v917_v39, %v915_v38 }
 0x104   : > { %v628_v52 = vpop.f32.mrf.mxu0  ;;  %1156 = vmatmul.bf16.gmra.mxu2 %v966_v42 }
 0x105   : > { %v754_v46 = vpop.f32.mrf.mxu3  ;;  %v717_v54 = vpop.f32.mrf.mxu1  ;;  %1245 = vmatmul.bf16.gmra.mxu3 %v967_v45  ;;  %v629_v62 = vadd.f32 %v628_v52, %v2743_v49 }
 0x106   : > { %v755_v55 = vadd.f32 %v754_v46, %v2745_v50  ;;  %v718_v63 = vadd.f32 %v717_v54, %v2745_v50  ;;  %v2884_v45 = vpop.f32.mrf.mxu2 }
 0x107   : > { %v854_v10 = vmul.f32 0.2, %v629_v62  ;;  %vm790_vm13 = vcmp.ge.f32.partialorder %v629_v62, 0.0 }
 0x108   : > { %vm821_vm12 = vcmp.ge.f32.partialorder %v755_v55, 0.0  ;;  %v885_v58 = vmul.f32 0.2, %v755_v55  ;;  %v855_v17 = vmul.f32 0.2, %v718_v63  ;;  %vm791_vm14 = vcmp.ge.f32.partialorder %v718_v63, 0.0 }
 0x109   : > { %v918_v27 = vsel %vm790_vm13, %v629_v62, %v854_v10 }
 0x10a   : > { %v2869_v61 = vsel %vm821_vm12, %v755_v55, %v885_v58  ;;  %v919_v30 = vsel %vm791_vm14, %v718_v63, %v855_v17  ;;  %v2902_v17 = vld [vmem:[%s3267_s4] ss:$0 sm:$0xff] }
 0x10b   : > { %v983_v0 = vpack.c.bf16 %v2869_v61, %v2867_v59  ;;  %v2499_v59 = vld [vmem:[%s3270_s7] sm:$0xff] }
 0x10c   : > { %v630_v3 = vpop.f32.mrf.mxu0  ;;  %1769 = vmatpush.bf16.msrb.mxu1 %v2499_v59 }
 0x10d   : > { %v757_v2 = vpop.f32.mrf.mxu3  ;;  %v719_v6 = vpop.f32.mrf.mxu1  ;;  %v631_v21 = vadd.f32 %v630_v3, %v2743_v49 }
 0x10e   : > { %v720_v22 = vadd.f32 %v719_v6, %v2745_v50  ;;  %v758_v23 = vadd.f32 %v757_v2, %v2745_v50  ;;  %v2894_v3 = vpop.f32.mrf.mxu2 }
 0x10f   : > { %vm792_vm15 = vcmp.ge.f32.partialorder %v631_v21, 0.0  ;;  %v856_v24 = vmul.f32 0.2, %v631_v21 }
 0x110   : > { %vm793_vm1 = vcmp.ge.f32.partialorder %v720_v22, 0.0  ;;  %v857_v25 = vmul.f32 0.2, %v720_v22  ;;  %v887_v36 = vmul.f32 0.2, %v758_v23  ;;  %vm823_vm2 = vcmp.ge.f32.partialorder %v758_v23, 0.0 }
 0x111   : > { %v920_v29 = vsel %vm792_vm15, %v631_v21, %v856_v24  ;;  %v639_v21 = vadd.f32 %v2753_v60, %v2743_v49  ;;  %vm808_vm15 = vcmp.ge.f32.partialorder %v651_v13, 0.0 }
 0x112   : > { %v921_v33 = vsel %vm793_vm1, %v720_v22, %v857_v25  ;;  %v968_v37 = vpack.c.bf16 %v920_v29, %v918_v27  ;;  %v2886_v52 = vsel %vm823_vm2, %v758_v23, %v887_v36  ;;  %v641_v22 = vadd.f32 %v2762_v14, %v2743_v49 }
 0x113   : > { %v969_v38 = vpack.c.bf16 %v921_v33, %v919_v30  ;;  %v862_v27 = vmul.f32 0.2, %v639_v21  ;;  %vm798_vm6 = vcmp.ge.f32.partialorder %v639_v21, 0.0 }
 0x114   : > { %v633_v40 = vpop.f32.mrf.mxu0  ;;  %1161 = vmatmul.bf16.gmra.mxu2 %v968_v37  ;;  %v864_v29 = vmul.f32 0.2, %v641_v22  ;;  %vm800_vm7 = vcmp.ge.f32.partialorder %v641_v22, 0.0 }
 0x115   : > { %v759_v39 = vpop.f32.mrf.mxu3  ;;  %1250 = vmatmul.bf16.gmra.mxu3 %v969_v38  ;;  %v634_v55 = vadd.f32 %v633_v40, %v2743_v49  ;;  %v926_v60 = vsel %vm798_vm6, %v639_v21, %v862_v27 }
 0x116   : > { %v760_v42 = vadd.f32 %v759_v39, %v2745_v50  ;;  %v928_v33 = vsel %vm800_vm7, %v641_v22, %v864_v29  ;;  %v649_v29 = vadd.f32 %v2793_v9, %v2743_v49 }
 0x117   : > { %v858_v63 = vmul.f32 0.2, %v634_v55  ;;  %vm794_vm4 = vcmp.ge.f32.partialorder %v634_v55, 0.0  ;;  %v972_v38 = vpack.c.bf16 %v928_v33, %v926_v60 }
 0x118   : > { %vm825_vm3 = vcmp.ge.f32.partialorder %v760_v42, 0.0  ;;  %v889_v46 = vmul.f32 0.2, %v760_v42  ;;  %v870_v33 = vmul.f32 0.2, %v649_v29  ;;  %vm806_vm14 = vcmp.ge.f32.partialorder %v649_v29, 0.0 }
 0x119   : > { %v922_v6 = vsel %vm794_vm4, %v634_v55, %v858_v63  ;;  %v646_v55 = vadd.f32 %v2787_v51, %v2743_v49 }
 0x11a   : > { %v2888_v54 = vsel %vm825_vm3, %v760_v42, %v889_v46  ;;  %v644_v46 = vadd.f32 %v2776_v34, %v2743_v49 }
 0x11b   : > { %v985_v58 = vpack.c.bf16 %v2888_v54, %v2886_v52  ;;  %vm804_vm11 = vcmp.ge.f32.partialorder %v646_v55, 0.0 }
 0x11c   : > { %v635_v62 = vpop.f32.mrf.mxu0  ;;  %vm802_vm10 = vcmp.ge.f32.partialorder %v644_v46, 0.0 }
 0x11d   : > { %v636_v2 = vadd.f32 %v635_v62, %v2743_v49 }
 0x11f   : > { %vm796_vm5 = vcmp.ge.f32.partialorder %v636_v2, 0.0  ;;  %v860_v50 = vmul.f32 0.2, %v636_v2 }
 0x121   : > { %v924_v8 = vsel %vm796_vm5, %v636_v2, %v860_v50 }
 0x122   : > { %v970_v10 = vpack.c.bf16 %v924_v8, %v922_v6  ;;  %v866_v6 = vmul.f32 0.2, %v644_v46  ;;  %v868_v8 = vmul.f32 0.2, %v646_v55 }
 0x124   : > { %1166 = vmatmul.bf16.gmra.mxu2 %v970_v10  ;;  %v930_v10 = vsel %vm802_vm10, %v644_v46, %v866_v6  ;;  %v932_v21 = vsel %vm804_vm11, %v646_v55, %v868_v8 }
 0x125   : > { %1255 = vmatmul.bf16.gmra.mxu3 %v971_v18  ;;  %v974_v51 = vpack.c.bf16 %v932_v21, %v930_v10 }
 0x127   : > { %v1127_v23 = vpop.f32.mrf.mxu2 }
 0x128   : > { %v1216_v24 = vpop.f32.mrf.mxu3  ;;  %v1128_v25 = vadd.f32 %v2902_v17, %v1127_v23 }
 0x12a   : > { %v1217_v15 = vadd.f32 %v1216_v24, %v1128_v25 }
 0x12c   : > { %v1328_v36 = vmul.f32 0.2, %v1217_v15  ;;  %vm1296_vm8 = vcmp.ge.f32.partialorder %v1217_v15, 0.0 }
 0x12e   : > { %v1360_v40 = vsel %vm1296_vm8, %v1217_v15, %v1328_v36  ;;  %v934_v36 = vsel %vm806_vm14, %v649_v29, %v870_v33 }
 0x12f   : > { %v1129_v18 = vpop.f32.mrf.mxu2 }
 0x130   : > { %v1218_v30 = vpop.f32.mrf.mxu3  ;;  %v1130_v14 = vadd.f32 %v2902_v17, %v1129_v18 }
 0x132   : > { %v1219_v37 = vadd.f32 %v1218_v30, %v1130_v14  ;;  %v872_v14 = vmul.f32 0.2, %v651_v13 }
 0x134   : > { %vm1297_vm9 = vcmp.ge.f32.partialorder %v1219_v37, 0.0  ;;  %v1329_v39 = vmul.f32 0.2, %v1219_v37  ;;  %1171 = vmatmul.bf16.gmra.mxu2 %v972_v38  ;;  %v936_v31 = vsel %vm808_vm15, %v651_v13, %v872_v14 }
 0x135   : > { %1260 = vmatmul.bf16.gmra.mxu3 %v973_v47 }
 0x136   : > { %v1361_v42 = vsel %vm1297_vm9, %v1219_v37, %v1329_v39 }
 0x137   : > { %v1132_v62 = vpop.f32.mrf.mxu2  ;;  %v1392_v2 = vpack.c.bf16 %v1361_v42, %v1360_v40  ;;  %v976_v40 = vpack.c.bf16 %v936_v31, %v934_v36  ;;  %v664_v31 = vadd.f32 %v2864_v35, %v2743_v49 }
 0x138   : > { %v1221_v63 = vpop.f32.mrf.mxu3  ;;  %v1133_v50 = vadd.f32 %v2902_v17, %v1132_v62  ;;  %v654_v62 = vadd.f32 %v2821_v56, %v2743_v49 }
 0x139   : > { %1484 = vmatmul.bf16.vlgmr.msrb.gmra.mxu0 %v1392_v2  ;;  %vm818_vm11 = vcmp.ge.f32.partialorder %v664_v31, 0.0 }
 0x13a   : > { %v1222_v43 = vadd.f32 %v1221_v63, %v1133_v50  ;;  %v656_v63 = vadd.f32 %v2828_v19, %v2743_v49  ;;  %vm810_vm3 = vcmp.ge.f32.partialorder %v654_v62, 0.0 }
 0x13c   : > { %v1330_v22 = vmul.f32 0.2, %v1222_v43  ;;  %vm1298_vm12 = vcmp.ge.f32.partialorder %v1222_v43, 0.0  ;;  %vm812_vm4 = vcmp.ge.f32.partialorder %v656_v63, 0.0 }
 0x13e   : > { %v1362_v25 = vsel %vm1298_vm12, %v1222_v43, %v1330_v22  ;;  %v874_v43 = vmul.f32 0.2, %v654_v62 }
 0x13f   : > { %v1134_v44 = vpop.f32.mrf.mxu2 }
 0x140   : > { %v1223_v47 = vpop.f32.mrf.mxu3  ;;  %v1135_v34 = vadd.f32 %v2902_v17, %v1134_v44  ;;  %v876_v44 = vmul.f32 0.2, %v656_v63 }
 0x142   : > { %v1224_v23 = vadd.f32 %v1223_v47, %v1135_v34  ;;  %v938_v47 = vsel %vm810_vm3, %v654_v62, %v874_v43  ;;  %v940_v10 = vsel %vm812_vm4, %v656_v63, %v876_v44  ;;  %v669_v44 = vadd.f32 %v2884_v45, %v2743_v49 }
 0x143   : > { %v978_v19 = vpack.c.bf16 %v940_v10, %v938_v47 }
 0x144   : > { %v1331_v24 = vmul.f32 0.2, %v1224_v23  ;;  %1176 = vmatmul.bf16.gmra.mxu2 %v974_v51  ;;  %vm1299_vm13 = vcmp.ge.f32.partialorder %v1224_v23, 0.0  ;;  %vm822_vm15 = vcmp.ge.f32.partialorder %v669_v44, 0.0 }
 0x145   : > { %1265 = vmatmul.bf16.gmra.mxu3 %v975_v20 }
 0x146   : > { %v1363_v27 = vsel %vm1299_vm13, %v1224_v23, %v1331_v24  ;;  %v659_v24 = vadd.f32 %v2844_v41, %v2743_v49 }
 0x147   : > { %v1137_v15 = vpop.f32.mrf.mxu2  ;;  %v1393_v30 = vpack.c.bf16 %v1363_v27, %v1362_v25  ;;  %v661_v25 = vadd.f32 %v2850_v5, %v2743_v49 }
 0x148   : > { %v1226_v18 = vpop.f32.mrf.mxu3  ;;  %v1138_v60 = vadd.f32 %v2902_v17, %v1137_v15  ;;  %vm814_vm7 = vcmp.ge.f32.partialorder %v659_v24, 0.0 }
 0x149   : > { %1489 = vmatmul.bf16.gmra.mxu0 %v1393_v30  ;;  %v880_v30 = vmul.f32 0.2, %v661_v25  ;;  %vm816_vm8 = vcmp.ge.f32.partialorder %v661_v25, 0.0 }
 0x14a   : > { %v1227_v16 = vadd.f32 %v1226_v18, %v1138_v60  ;;  %v878_v18 = vmul.f32 0.2, %v659_v24 }
 0x14b   : > { %v944_v5 = vsel %vm816_vm8, %v661_v25, %v880_v30 }
 0x14c   : > { %v1332_v38 = vmul.f32 0.2, %v1227_v16  ;;  %vm1300_vm1 = vcmp.ge.f32.partialorder %v1227_v16, 0.0  ;;  %v942_v60 = vsel %vm814_vm7, %v659_v24, %v878_v18 }
 0x14e   : > { %v1364_v46 = vsel %vm1300_vm1, %v1227_v16, %v1332_v38  ;;  %v980_v16 = vpack.c.bf16 %v944_v5, %v942_v60 }
 0x14f   : > { %v1139_v9 = vpop.f32.mrf.mxu2 }
 0x150   : > { %v1228_v20 = vpop.f32.mrf.mxu3  ;;  %v1140_v37 = vadd.f32 %v2902_v17, %v1139_v9 }
 0x152   : > { %v1229_v39 = vadd.f32 %v1228_v20, %v1140_v37  ;;  %v666_v37 = vadd.f32 %v2875_v1, %v2743_v49 }
 0x154   : > { %v1333_v42 = vmul.f32 0.2, %v1229_v39  ;;  %1181 = vmatmul.bf16.gmra.mxu2 %v976_v40  ;;  %vm1301_vm2 = vcmp.ge.f32.partialorder %v1229_v39, 0.0  ;;  %vm820_vm12 = vcmp.ge.f32.partialorder %v666_v37, 0.0 }
 0x155   : > { %1270 = vmatmul.bf16.gmra.mxu3 %v977_v57 }
 0x156   : > { %v1365_v55 = vsel %vm1301_vm2, %v1229_v39, %v1333_v42 }
 0x157   : > { %v1142_v2 = vpop.f32.mrf.mxu2  ;;  %v1394_v6 = vpack.c.bf16 %v1365_v55, %v1364_v46  ;;  %v882_v46 = vmul.f32 0.2, %v664_v31  ;;  %v884_v55 = vmul.f32 0.2, %v666_v37 }
 0x158   : > { %v1231_v50 = vpop.f32.mrf.mxu3  ;;  %v1143_v8 = vadd.f32 %v2902_v17, %v1142_v2 }
 0x159   : > { %1494 = vmatmul.bf16.gmra.mxu0 %v1394_v6  ;;  %v946_v62 = vsel %vm818_vm11, %v664_v31, %v882_v46  ;;  %v948_v63 = vsel %vm820_vm12, %v666_v37, %v884_v55  ;;  %vm1713_vm11 = vcmask 523264  }
 0x15a   : > { %v1232_v48 = vadd.f32 %v1231_v50, %v1143_v8  ;;  %v982_v1 = vpack.c.bf16 %v948_v63, %v946_v62 }
 0x15c   : > { %v1334_v21 = vmul.f32 0.2, %v1232_v48  ;;  %vm1302_vm5 = vcmp.ge.f32.partialorder %v1232_v48, 0.0 }
 0x15e   : > { %v1366_v23 = vsel %vm1302_vm5, %v1232_v48, %v1334_v21  ;;  %v671_v48 = vadd.f32 %v2894_v3, %v2743_v49 }
 0x15f   : > { %v1144_v53 = vpop.f32.mrf.mxu2 }
 0x160   : > { %v1233_v57 = vpop.f32.mrf.mxu3  ;;  %v1145_v56 = vadd.f32 %v2902_v17, %v1144_v53  ;;  %v888_v21 = vmul.f32 0.2, %v671_v48  ;;  %vm824_vm1 = vcmp.ge.f32.partialorder %v671_v48, 0.0 }
 0x162   : > { %v1234_v34 = vadd.f32 %v1233_v57, %v1145_v56  ;;  %v886_v56 = vmul.f32 0.2, %v669_v44  ;;  %v952_v49 = vsel %vm824_vm1, %v671_v48, %v888_v21 }
 0x164   : > { %vm1303_vm6 = vcmp.ge.f32.partialorder %v1234_v34, 0.0  ;;  %v1335_v22 = vmul.f32 0.2, %v1234_v34  ;;  %1186 = vmatmul.bf16.gmra.mxu2 %v978_v19 }
 0x165   : > { %1275 = vmatmul.bf16.gmra.mxu3 %v979_v32 }
 0x166   : > { %v1367_v51 = vsel %vm1303_vm6, %v1234_v34, %v1335_v22  ;;  %v950_v34 = vsel %vm822_vm15, %v669_v44, %v886_v56 }
 0x167   : > { %v1147_v27 = vpop.f32.mrf.mxu2  ;;  %v1395_v13 = vpack.c.bf16 %v1367_v51, %v1366_v23  ;;  %v984_v23 = vpack.c.bf16 %v952_v49, %v950_v34 }
 0x168   : > { %v1236_v29 = vpop.f32.mrf.mxu3  ;;  %v1148_v15 = vadd.f32 %v2902_v17, %v1147_v27 }
 0x169   : > { %1499 = vmatmul.bf16.gmra.mxu0 %v1395_v13 }
 0x16a   : > { %v1237_v28 = vadd.f32 %v1236_v29, %v1148_v15 }
 0x16c   : > { %v1336_v14 = vmul.f32 0.2, %v1237_v28  ;;  %vm1304_vm9 = vcmp.ge.f32.partialorder %v1237_v28, 0.0 }
 0x16e   : > { %v1368_v20 = vsel %vm1304_vm9, %v1237_v28, %v1336_v14 }
 0x16f   : > { %v1149_v32 = vpop.f32.mrf.mxu2 }
 0x170   : > { %v1238_v41 = vpop.f32.mrf.mxu3  ;;  %v1150_v33 = vadd.f32 %v2902_v17, %v1149_v32 }
 0x172   : > { %v1239_v11 = vadd.f32 %v1238_v41, %v1150_v33 }
 0x174   : > { %vm1305_vm10 = vcmp.ge.f32.partialorder %v1239_v11, 0.0  ;;  %v1337_v9 = vmul.f32 0.2, %v1239_v11  ;;  %1191 = vmatmul.bf16.gmra.mxu2 %v980_v16 }
 0x175   : > { %1280 = vmatmul.bf16.gmra.mxu3 %v981_v12 }
 0x176   : > { %v1369_v36 = vsel %vm1305_vm10, %v1239_v11, %v1337_v9 }
 0x177   : > { %v1152_v38 = vpop.f32.mrf.mxu2  ;;  %v1396_v40 = vpack.c.bf16 %v1369_v36, %v1368_v20 }
 0x178   : > { %v1241_v39 = vpop.f32.mrf.mxu3  ;;  %v1153_v42 = vadd.f32 %v2902_v17, %v1152_v38 }
 0x179   : > { %1504 = vmatmul.bf16.gmra.mxu0 %v1396_v40 }
 0x17a   : > { %v1242_v4 = vadd.f32 %v1241_v39, %v1153_v42  ;;  %v2986_v42 = vld [vmem:[%s3269_s6] ss:$0 sm:$0xff] }
 0x17c   : > { %v1338_v2 = vmul.f32 0.2, %v1242_v4  ;;  %vm1306_vm13 = vcmp.ge.f32.partialorder %v1242_v4, 0.0 }
 0x17e   : > { %v1370_v8 = vsel %vm1306_vm13, %v1242_v4, %v1338_v2 }
 0x17f   : > { %v1154_v7 = vpop.f32.mrf.mxu2 }
 0x180   : > { %v1243_v12 = vpop.f32.mrf.mxu3  ;;  %v1155_v35 = vadd.f32 %v2902_v17, %v1154_v7 }
 0x182   : > { %v1244_v50 = vadd.f32 %v1243_v12, %v1155_v35 }
 0x184   : > { %vm1307_vm14 = vcmp.ge.f32.partialorder %v1244_v50, 0.0  ;;  %v1339_v6 = vmul.f32 0.2, %v1244_v50  ;;  %1196 = vmatmul.bf16.gmra.mxu2 %v982_v1 }
 0x185   : > { %1285 = vmatmul.bf16.gmra.mxu3 %v983_v0 }
 0x186   : > { %v1371_v43 = vsel %vm1307_vm14, %v1244_v50, %v1339_v6 }
 0x187   : > { %v1157_v53 = vpop.f32.mrf.mxu2  ;;  %v1397_v47 = vpack.c.bf16 %v1371_v43, %v1370_v8 }
 0x188   : > { %v1246_v57 = vpop.f32.mrf.mxu3  ;;  %v1158_v10 = vadd.f32 %v2902_v17, %v1157_v53 }
 0x189   : > { %1509 = vmatmul.bf16.gmra.mxu0 %v1397_v47 }
 0x18a   : > { %v1247_v61 = vadd.f32 %v1246_v57, %v1158_v10 }
 0x18c   : > { %v1340_v19 = vmul.f32 0.2, %v1247_v61  ;;  %vm1308_vm2 = vcmp.ge.f32.partialorder %v1247_v61, 0.0 }
 0x18e   : > { %v1372_v24 = vsel %vm1308_vm2, %v1247_v61, %v1340_v19 }
 0x18f   : > { %v1159_v0 = vpop.f32.mrf.mxu2 }
 0x190   : > { %v1248_v45 = vpop.f32.mrf.mxu3  ;;  %v1160_v3 = vadd.f32 %v2902_v17, %v1159_v0 }
 0x192   : > { %v1249_v22 = vadd.f32 %v1248_v45, %v1160_v3 }
 0x194   : > { %vm1309_vm3 = vcmp.ge.f32.partialorder %v1249_v22, 0.0  ;;  %v1341_v51 = vmul.f32 0.2, %v1249_v22  ;;  %1201 = vmatmul.bf16.gmra.mxu2 %v984_v23 }
 0x195   : > { %1290 = vmatmul.bf16.gmra.mxu3 %v985_v58 }
 0x196   : > { %v1373_v25 = vsel %vm1309_vm3, %v1249_v22, %v1341_v51 }
 0x197   : > { %v1162_v27 = vpop.f32.mrf.mxu2  ;;  %v1398_v13 = vpack.c.bf16 %v1373_v25, %v1372_v24 }
 0x198   : > { %v1251_v29 = vpop.f32.mrf.mxu3  ;;  %v1163_v15 = vadd.f32 %v2902_v17, %v1162_v27 }
 0x199   : > { %1514 = vmatmul.bf16.gmra.mxu0 %v1398_v13 }
 0x19a   : > { %v1252_v18 = vadd.f32 %v1251_v29, %v1163_v15 }
 0x19c   : > { %v1342_v32 = vmul.f32 0.2, %v1252_v18  ;;  %vm1310_vm4 = vcmp.ge.f32.partialorder %v1252_v18, 0.0 }
 0x19e   : > { %v1374_v52 = vsel %vm1310_vm4, %v1252_v18, %v1342_v32 }
 0x19f   : > { %v1164_v30 = vpop.f32.mrf.mxu2 }
 0x1a0   : > { %v1253_v26 = vpop.f32.mrf.mxu3  ;;  %v1165_v28 = vadd.f32 %v2902_v17, %v1164_v30 }
 0x1a2   : > { %v1254_v41 = vadd.f32 %v1253_v26, %v1165_v28 }
 0x1a4   : > { %vm1311_vm5 = vcmp.ge.f32.partialorder %v1254_v41, 0.0  ;;  %v1343_v60 = vmul.f32 0.2, %v1254_v41 }
 0x1a6   : > { %v1375_v54 = vsel %vm1311_vm5, %v1254_v41, %v1343_v60 }
 0x1a7   : > { %v1167_v58 = vpop.f32.mrf.mxu2  ;;  %v1399_v33 = vpack.c.bf16 %v1375_v54, %v1374_v52 }
 0x1a8   : > { %v1256_v5 = vpop.f32.mrf.mxu3  ;;  %v1168_v14 = vadd.f32 %v2902_v17, %v1167_v58 }
 0x1a9   : > { %1519 = vmatmul.bf16.gmra.mxu0 %v1399_v33 }
 0x1aa   : > { %v1257_v11 = vadd.f32 %v1256_v5, %v1168_v14 }
 0x1ac   : > { %v1344_v36 = vmul.f32 0.2, %v1257_v11  ;;  %vm1312_vm6 = vcmp.ge.f32.partialorder %v1257_v11, 0.0 }
 0x1ae   : > { %v1376_v39 = vsel %vm1312_vm6, %v1257_v11, %v1344_v36 }
 0x1af   : > { %v1169_v16 = vpop.f32.mrf.mxu2 }
 0x1b0   : > { %v1258_v9 = vpop.f32.mrf.mxu3  ;;  %v1170_v20 = vadd.f32 %v2902_v17, %v1169_v16 }
 0x1b2   : > { %v1259_v31 = vadd.f32 %v1258_v9, %v1170_v20 }
 0x1b4   : > { %vm1313_vm7 = vcmp.ge.f32.partialorder %v1259_v31, 0.0  ;;  %v1345_v37 = vmul.f32 0.2, %v1259_v31 }
 0x1b6   : > { %v1485_v38 = vpop.f32.mrf.mxu0  ;;  %v1377_v40 = vsel %vm1313_vm7, %v1259_v31, %v1345_v37 }
 0x1b7   : > { %v1172_v46 = vpop.f32.mrf.mxu2  ;;  %v1400_v4 = vpack.c.bf16 %v1377_v40, %v1376_v39  ;;  %v1486_v12 = vadd.f32 %v2986_v42, %v1485_v38 }
 0x1b8   : > { %v1261_v55 = vpop.f32.mrf.mxu3  ;;  %v1173_v7 = vadd.f32 %v2902_v17, %v1172_v46 }
 0x1b9   : > { %1524 = vmatmul.bf16.gmra.mxu0 %v1400_v4  ;;  %v1597_v35 = vmul.f32 0.2, %v1486_v12  ;;  %vm1565_vm8 = vcmp.ge.f32.partialorder %v1486_v12, 0.0 }
 0x1ba   : > { %v1262_v62 = vadd.f32 %v1261_v55, %v1173_v7 }
 0x1bb   : > { %v1629_v48 = vsel %vm1565_vm8, %v1486_v12, %v1597_v35 }
 0x1bc   : > { %v1346_v43 = vmul.f32 0.2, %v1262_v62  ;;  %vm1314_vm10 = vcmp.ge.f32.partialorder %v1262_v62, 0.0 }
 0x1be   : > { %v1487_v63 = vpop.f32.mrf.mxu0  ;;  %v1378_v56 = vsel %vm1314_vm10, %v1262_v62, %v1346_v43 }
 0x1bf   : > { %v1488_v2 = vadd.f32 %v2986_v42, %v1487_v63  ;;  %v1174_v50 = vpop.f32.mrf.mxu2 }
 0x1c0   : > { %v1263_v1 = vpop.f32.mrf.mxu3  ;;  %v1175_v6 = vadd.f32 %v2902_v17, %v1174_v50 }
 0x1c1   : > { %vm1566_vm9 = vcmp.ge.f32.partialorder %v1488_v2, 0.0  ;;  %v1598_v8 = vmul.f32 0.2, %v1488_v2 }
 0x1c2   : > { %v1264_v44 = vadd.f32 %v1263_v1, %v1175_v6 }
 0x1c3   : > { %v1630_v53 = vsel %vm1566_vm9, %v1488_v2, %v1598_v8 }
 0x1c4   : > { %v1661_v57 = vpack.c.bf16 %v1630_v53, %v1629_v48  ;;  %vm1315_vm12 = vcmp.ge.f32.partialorder %v1264_v44, 0.0  ;;  %v1347_v47 = vmul.f32 0.2, %v1264_v44 }
 0x1c6   : > { %v1490_v10 = vpop.f32.mrf.mxu0  ;;  %2437 = vmatmul.msk.bf16.vlgmr.msrb.gmra.mxu1 %vm1713_vm11, %v1661_v57  ;;  %v1379_v21 = vsel %vm1315_vm12, %v1264_v44, %v1347_v47 }
 0x1c7   : > { %v1177_v59 = vpop.f32.mrf.mxu2  ;;  %v1401_v0 = vpack.c.bf16 %v1379_v21, %v1378_v56  ;;  %v1491_v34 = vadd.f32 %v2986_v42, %v1490_v10 }
 0x1c8   : > { %v1266_v61 = vpop.f32.mrf.mxu3  ;;  %v1178_v45 = vadd.f32 %v2902_v17, %v1177_v59 }
 0x1c9   : > { %1529 = vmatmul.bf16.gmra.mxu0 %v1401_v0  ;;  %v1599_v19 = vmul.f32 0.2, %v1491_v34  ;;  %vm1567_vm13 = vcmp.ge.f32.partialorder %v1491_v34, 0.0 }
 0x1ca   : > { %v1267_v49 = vadd.f32 %v1266_v61, %v1178_v45 }
 0x1cb   : > { %v1631_v13 = vsel %vm1567_vm13, %v1491_v34, %v1599_v19 }
 0x1cc   : > { %v1348_v27 = vmul.f32 0.2, %v1267_v49  ;;  %vm1316_vm15 = vcmp.ge.f32.partialorder %v1267_v49, 0.0 }
 0x1ce   : > { %v1492_v3 = vpop.f32.mrf.mxu0  ;;  %v1380_v28 = vsel %vm1316_vm15, %v1267_v49, %v1348_v27 }
 0x1cf   : > { %v1493_v22 = vadd.f32 %v2986_v42, %v1492_v3  ;;  %v1179_v23 = vpop.f32.mrf.mxu2 }
 0x1d0   : > { %v1268_v51 = vpop.f32.mrf.mxu3  ;;  %v1180_v24 = vadd.f32 %v2902_v17, %v1179_v23 }
 0x1d1   : > { %vm1568_vm14 = vcmp.ge.f32.partialorder %v1493_v22, 0.0  ;;  %v1600_v25 = vmul.f32 0.2, %v1493_v22 }
 0x1d2   : > { %v1269_v29 = vadd.f32 %v1268_v51, %v1180_v24 }
 0x1d3   : > { %v1632_v15 = vsel %vm1568_vm14, %v1493_v22, %v1600_v25 }
 0x1d4   : > { %vm1317_vm1 = vcmp.ge.f32.partialorder %v1269_v29, 0.0  ;;  %v1349_v18 = vmul.f32 0.2, %v1269_v29  ;;  %v1662_v30 = vpack.c.bf16 %v1632_v15, %v1631_v13 }
 0x1d6   : > { %v1495_v26 = vpop.f32.mrf.mxu0  ;;  %2438 = vmatmul.msk.bf16.gmra.mxu1 %vm1713_vm11, %v1662_v30  ;;  %v1381_v32 = vsel %vm1317_vm1, %v1269_v29, %v1349_v18 }
 0x1d7   : > { %v1182_v41 = vpop.f32.mrf.mxu2  ;;  %v1402_v52 = vpack.c.bf16 %v1381_v32, %v1380_v28  ;;  %v1496_v58 = vadd.f32 %v2986_v42, %v1495_v26 }
 0x1d8   : > { %v1271_v60 = vpop.f32.mrf.mxu3  ;;  %v1183_v54 = vadd.f32 %v2902_v17, %v1182_v41 }
 0x1d9   : > { %1534 = vmatmul.bf16.gmra.mxu0 %v1402_v52  ;;  %v1601_v14 = vmul.f32 0.2, %v1496_v58  ;;  %vm1569_vm2 = vcmp.ge.f32.partialorder %v1496_v58, 0.0 }
 0x1da   : > { %v1272_v5 = vadd.f32 %v1271_v60, %v1183_v54 }
 0x1db   : > { %v1633_v38 = vsel %vm1569_vm2, %v1496_v58, %v1601_v14 }
 0x1dc   : > { %v1350_v31 = vmul.f32 0.2, %v1272_v5  ;;  %vm1318_vm4 = vcmp.ge.f32.partialorder %v1272_v5, 0.0 }
 0x1de   : > { %v1497_v33 = vpop.f32.mrf.mxu0  ;;  %v1382_v4 = vsel %vm1318_vm4, %v1272_v5, %v1350_v31 }
 0x1df   : > { %v1498_v11 = vadd.f32 %v2986_v42, %v1497_v33  ;;  %v1184_v16 = vpop.f32.mrf.mxu2 }
 0x1e0   : > { %v1273_v9 = vpop.f32.mrf.mxu3  ;;  %v1185_v20 = vadd.f32 %v2902_v17, %v1184_v16 }
 0x1e1   : > { %vm1570_vm3 = vcmp.ge.f32.partialorder %v1498_v11, 0.0  ;;  %v1602_v36 = vmul.f32 0.2, %v1498_v11 }
 0x1e2   : > { %v1274_v37 = vadd.f32 %v1273_v9, %v1185_v20 }
 0x1e3   : > { %v1634_v39 = vsel %vm1570_vm3, %v1498_v11, %v1602_v36 }
 0x1e4   : > { %vm1319_vm5 = vcmp.ge.f32.partialorder %v1274_v37, 0.0  ;;  %v1351_v40 = vmul.f32 0.2, %v1274_v37  ;;  %v1663_v46 = vpack.c.bf16 %v1634_v39, %v1633_v38 }
 0x1e6   : > { %v1500_v55 = vpop.f32.mrf.mxu0  ;;  %2439 = vmatmul.msk.bf16.gmra.mxu1 %vm1713_vm11, %v1663_v46  ;;  %v1383_v7 = vsel %vm1319_vm5, %v1274_v37, %v1351_v40 }
 0x1e7   : > { %v1187_v12 = vpop.f32.mrf.mxu2  ;;  %v1403_v63 = vpack.c.bf16 %v1383_v7, %v1382_v4  ;;  %v1501_v2 = vadd.f32 %v2986_v42, %v1500_v55 }
 0x1e8   : > { %v1276_v62 = vpop.f32.mrf.mxu3  ;;  %v1188_v35 = vadd.f32 %v2902_v17, %v1187_v12 }
 0x1e9   : > { %1539 = vmatmul.bf16.gmra.mxu0 %v1403_v63  ;;  %v1603_v6 = vmul.f32 0.2, %v1501_v2  ;;  %vm1571_vm6 = vcmp.ge.f32.partialorder %v1501_v2, 0.0 }
 0x1ea   : > { %v1277_v50 = vadd.f32 %v1276_v62, %v1188_v35 }
 0x1eb   : > { %v1635_v10 = vsel %vm1571_vm6, %v1501_v2, %v1603_v6 }
 0x1ec   : > { %v1352_v57 = vmul.f32 0.2, %v1277_v50  ;;  %vm1320_vm8 = vcmp.ge.f32.partialorder %v1277_v50, 0.0 }
 0x1ee   : > { %v1502_v1 = vpop.f32.mrf.mxu0  ;;  %v1384_v0 = vsel %vm1320_vm8, %v1277_v50, %v1352_v57 }
 0x1ef   : > { %v1503_v8 = vadd.f32 %v2986_v42, %v1502_v1  ;;  %v1189_v43 = vpop.f32.mrf.mxu2 }
 0x1f0   : > { %v1278_v44 = vpop.f32.mrf.mxu3  ;;  %v1190_v48 = vadd.f32 %v2902_v17, %v1189_v43 }
 0x1f1   : > { %vm1572_vm7 = vcmp.ge.f32.partialorder %v1503_v8, 0.0  ;;  %v1604_v53 = vmul.f32 0.2, %v1503_v8 }
 0x1f2   : > { %v1279_v47 = vadd.f32 %v1278_v44, %v1190_v48 }
 0x1f3   : > { %v1636_v56 = vsel %vm1572_vm7, %v1503_v8, %v1604_v53 }
 0x1f4   : > { %vm1321_vm9 = vcmp.ge.f32.partialorder %v1279_v47, 0.0  ;;  %v1353_v21 = vmul.f32 0.2, %v1279_v47  ;;  %v1664_v59 = vpack.c.bf16 %v1636_v56, %v1635_v10 }
 0x1f6   : > { %v1505_v61 = vpop.f32.mrf.mxu0  ;;  %2440 = vmatmul.msk.bf16.gmra.mxu1 %vm1713_vm11, %v1664_v59  ;;  %v1385_v45 = vsel %vm1321_vm9, %v1279_v47, %v1353_v21 }
 0x1f7   : > { %v1192_v34 = vpop.f32.mrf.mxu2  ;;  %v1404_v3 = vpack.c.bf16 %v1385_v45, %v1384_v0  ;;  %v1506_v22 = vadd.f32 %v2986_v42, %v1505_v61 }
 0x1f8   : > { %v1281_v49 = vpop.f32.mrf.mxu3  ;;  %v1193_v19 = vadd.f32 %v2902_v17, %v1192_v34 }
 0x1f9   : > { %1544 = vmatmul.bf16.gmra.mxu0 %v1404_v3  ;;  %v1605_v24 = vmul.f32 0.2, %v1506_v22  ;;  %vm1573_vm10 = vcmp.ge.f32.partialorder %v1506_v22, 0.0 }
 0x1fa   : > { %v1282_v23 = vadd.f32 %v1281_v49, %v1193_v19 }
 0x1fb   : > { %v1637_v26 = vsel %vm1573_vm10, %v1506_v22, %v1605_v24 }
 0x1fc   : > { %v1354_v18 = vmul.f32 0.2, %v1282_v23  ;;  %vm1322_vm13 = vcmp.ge.f32.partialorder %v1282_v23, 0.0 }
 0x1fe   : > { %v1507_v51 = vpop.f32.mrf.mxu0  ;;  %v1386_v52 = vsel %vm1322_vm13, %v1282_v23, %v1354_v18 }
 0x1ff   : > { %v1508_v25 = vadd.f32 %v2986_v42, %v1507_v51  ;;  %v1194_v27 = vpop.f32.mrf.mxu2 }
 0x200   : > { %v1283_v29 = vpop.f32.mrf.mxu3  ;;  %v1195_v13 = vadd.f32 %v2902_v17, %v1194_v27 }
 0x201   : > { %vm1574_vm12 = vcmp.ge.f32.partialorder %v1508_v25, 0.0  ;;  %v1606_v15 = vmul.f32 0.2, %v1508_v25 }
 0x202   : > { %v1284_v30 = vadd.f32 %v1283_v29, %v1195_v13 }
 0x203   : > { %v1638_v28 = vsel %vm1574_vm12, %v1508_v25, %v1606_v15 }
 0x204   : > { %v1665_v32 = vpack.c.bf16 %v1638_v28, %v1637_v26  ;;  %vm1323_vm14 = vcmp.ge.f32.partialorder %v1284_v30, 0.0  ;;  %v1355_v41 = vmul.f32 0.2, %v1284_v30 }
 0x206   : > { %v1510_v60 = vpop.f32.mrf.mxu0  ;;  %2441 = vmatmul.msk.bf16.gmra.mxu1 %vm1713_vm11, %v1665_v32  ;;  %v1387_v54 = vsel %vm1323_vm14, %v1284_v30, %v1355_v41  ;;  %v3031_v32 = vld [vmem:[%s3271_s8] ss:$0 sm:$0xff] }
 0x207   : > { %v1197_v58 = vpop.f32.mrf.mxu2  ;;  %v1405_v33 = vpack.c.bf16 %v1387_v54, %v1386_v52  ;;  %v1511_v11 = vadd.f32 %v2986_v42, %v1510_v60 }
 0x208   : > { %v1286_v5 = vpop.f32.mrf.mxu3  ;;  %v1198_v14 = vadd.f32 %v2902_v17, %v1197_v58 }
 0x209   : > { %1549 = vmatmul.bf16.gmra.mxu0 %v1405_v33  ;;  %v1607_v20 = vmul.f32 0.2, %v1511_v11  ;;  %vm1575_vm15 = vcmp.ge.f32.partialorder %v1511_v11, 0.0  ;;  %v3037_v33 = vld [vmem:[%s3272_s9] ss:$0 sm:$0xff] }
 0x20a   : > { %v1287_v16 = vadd.f32 %v1286_v5, %v1198_v14 }
 0x20b   : > { %v1639_v55 = vsel %vm1575_vm15, %v1511_v11, %v1607_v20 }
 0x20c   : > { %v1356_v40 = vmul.f32 0.2, %v1287_v16  ;;  %vm1324_vm2 = vcmp.ge.f32.partialorder %v1287_v16, 0.0 }
 0x20e   : > { %v1512_v9 = vpop.f32.mrf.mxu0  ;;  %v1388_v63 = vsel %vm1324_vm2, %v1287_v16, %v1356_v40 }
 0x20f   : > { %v1513_v36 = vadd.f32 %v2986_v42, %v1512_v9  ;;  %v1199_v31 = vpop.f32.mrf.mxu2 }
 0x210   : > { %v1288_v37 = vpop.f32.mrf.mxu3  ;;  %v1200_v38 = vadd.f32 %v2902_v17, %v1199_v31 }
 0x211   : > { %vm1576_vm1 = vcmp.ge.f32.partialorder %v1513_v36, 0.0  ;;  %v1608_v39 = vmul.f32 0.2, %v1513_v36 }
 0x212   : > { %v1289_v46 = vadd.f32 %v1288_v37, %v1200_v38 }
 0x213   : > { %v1640_v4 = vsel %vm1576_vm1, %v1513_v36, %v1608_v39 }
 0x214   : > { %v1666_v7 = vpack.c.bf16 %v1640_v4, %v1639_v55  ;;  %vm1325_vm3 = vcmp.ge.f32.partialorder %v1289_v46, 0.0  ;;  %v1357_v12 = vmul.f32 0.2, %v1289_v46 }
 0x216   : > { %v1515_v62 = vpop.f32.mrf.mxu0  ;;  %2442 = vmatmul.msk.bf16.gmra.mxu1 %vm1713_vm11, %v1666_v7  ;;  %v1389_v35 = vsel %vm1325_vm3, %v1289_v46, %v1357_v12 }
 0x217   : > { %v1202_v2 = vpop.f32.mrf.mxu2  ;;  %v1406_v1 = vpack.c.bf16 %v1389_v35, %v1388_v63  ;;  %v1516_v8 = vadd.f32 %v2986_v42, %v1515_v62 }
 0x218   : > { %v1291_v50 = vpop.f32.mrf.mxu3  ;;  %v1203_v6 = vadd.f32 %v2902_v17, %v1202_v2 }
 0x219   : > { %1554 = vmatmul.bf16.gmra.mxu0 %v1406_v1  ;;  %v1609_v48 = vmul.f32 0.2, %v1516_v8  ;;  %vm1577_vm4 = vcmp.ge.f32.partialorder %v1516_v8, 0.0 }
 0x21a   : > { %v1292_v43 = vadd.f32 %v1291_v50, %v1203_v6 }
 0x21b   : > { %v1641_v61 = vsel %vm1577_vm4, %v1516_v8, %v1609_v48 }
 0x21c   : > { %v1358_v21 = vmul.f32 0.2, %v1292_v43  ;;  %vm1326_vm6 = vcmp.ge.f32.partialorder %v1292_v43, 0.0 }
 0x21e   : > { %v1517_v44 = vpop.f32.mrf.mxu0  ;;  %v1390_v49 = vsel %vm1326_vm6, %v1292_v43, %v1358_v21 }
 0x21f   : > { %v1518_v53 = vadd.f32 %v2986_v42, %v1517_v44  ;;  %v1204_v57 = vpop.f32.mrf.mxu2 }
 0x220   : > { %v1205_v47 = vadd.f32 %v2902_v17, %v1204_v57  ;;  %v1293_v56 = vpop.f32.mrf.mxu3 }
 0x221   : > { %vm1578_vm5 = vcmp.ge.f32.partialorder %v1518_v53, 0.0  ;;  %v1610_v10 = vmul.f32 0.2, %v1518_v53 }
 0x222   : > { %v1294_v59 = vadd.f32 %v1293_v56, %v1205_v47 }
 0x223   : > { %v1642_v0 = vsel %vm1578_vm5, %v1518_v53, %v1610_v10 }
 0x224   : > { %v1667_v45 = vpack.c.bf16 %v1642_v0, %v1641_v61  ;;  %vm1327_vm7 = vcmp.ge.f32.partialorder %v1294_v59, 0.0  ;;  %v1359_v34 = vmul.f32 0.2, %v1294_v59 }
 0x226   : > { %v1391_v3 = vsel %vm1327_vm7, %v1294_v59, %v1359_v34  ;;  %v1520_v19 = vpop.f32.mrf.mxu0  ;;  %2443 = vmatmul.msk.bf16.gmra.mxu1 %vm1713_vm11, %v1667_v45 }
 0x227   : > { %v1407_v22 = vpack.c.bf16 %v1391_v3, %v1390_v49  ;;  %v1521_v17 = vadd.f32 %v2986_v42, %v1520_v19 }
 0x229   : > { %1559 = vmatmul.bf16.vlgmr.msra.gmra.mxu2 %v1407_v22  ;;  %v1611_v51 = vmul.f32 0.2, %v1521_v17  ;;  %vm1579_vm8 = vcmp.ge.f32.partialorder %v1521_v17, 0.0 }
 0x22b   : > { %v1643_v27 = vsel %vm1579_vm8, %v1521_v17, %v1611_v51 }
 0x22e   : > { %v1522_v23 = vpop.f32.mrf.mxu0 }
 0x22f   : > { %v1523_v24 = vadd.f32 %v2986_v42, %v1522_v23 }
 0x231   : > { %vm1580_vm9 = vcmp.ge.f32.partialorder %v1523_v24, 0.0  ;;  %v1612_v25 = vmul.f32 0.2, %v1523_v24 }
 0x233   : > { %v1644_v29 = vsel %vm1580_vm9, %v1523_v24, %v1612_v25 }
 0x234   : > { %v1668_v13 = vpack.c.bf16 %v1644_v29, %v1643_v27 }
 0x236   : > { %v1525_v15 = vpop.f32.mrf.mxu0  ;;  %2444 = vmatmul.msk.bf16.gmra.mxu1 %vm1713_vm11, %v1668_v13 }
 0x237   : > { %v1526_v18 = vadd.f32 %v2986_v42, %v1525_v15 }
 0x239   : > { %v1613_v26 = vmul.f32 0.2, %v1526_v18  ;;  %vm1581_vm10 = vcmp.ge.f32.partialorder %v1526_v18, 0.0 }
 0x23b   : > { %v1645_v60 = vsel %vm1581_vm10, %v1526_v18, %v1613_v26 }
 0x23e   : > { %v1527_v30 = vpop.f32.mrf.mxu0 }
 0x23f   : > { %v1528_v28 = vadd.f32 %v2986_v42, %v1527_v30 }
 0x241   : > { %vm1582_vm12 = vcmp.ge.f32.partialorder %v1528_v28, 0.0  ;;  %v1614_v41 = vmul.f32 0.2, %v1528_v28 }
 0x243   : > { %v1646_v52 = vsel %vm1582_vm12, %v1528_v28, %v1614_v41  ;;  %v1771_v54 = vpop.f32.mrf.mxu1 }
 0x244   : > { %v1669_v58 = vpack.c.bf16 %v1646_v52, %v1645_v60  ;;  %v1772_v5 = vadd.f32 %v3031_v32, %v1771_v54 }
 0x246   : > { %v1883_v14 = vmul.f32 0.2, %v1772_v5  ;;  %v1530_v11 = vpop.f32.mrf.mxu0  ;;  %2445 = vmatmul.msk.bf16.gmra.mxu1 %vm1713_vm11, %v1669_v58  ;;  %vm1851_vm13 = vcmp.ge.f32.partialorder %v1772_v5, 0.0 }
 0x247   : > { %v1531_v20 = vadd.f32 %v2986_v42, %v1530_v11 }
 0x248   : > { %v1915_v16 = vsel %vm1851_vm13, %v1772_v5, %v1883_v14 }
 0x249   : > { %v1951_v9 = vmul.f32 %v3037_v33, %v1915_v16  ;;  %v1615_v40 = vmul.f32 0.2, %v1531_v20  ;;  %vm1583_vm15 = vcmp.ge.f32.partialorder %v1531_v20, 0.0 }
 0x24b   : > { %v1773_v36 = vpop.f32.mrf.mxu1  ;;  %v1983_v31 = vsel %vm535_vm0, %v1951_v9, 0.0  ;;  %v1647_v12 = vsel %vm1583_vm15, %v1531_v20, %v1615_v40 }
 0x24c   : > { %v1774_v37 = vadd.f32 %v3031_v32, %v1773_v36  ;;  %1984 = vadd.xlane.f32.xlu0 %v1983_v31 }
 0x24e   : > { %v1884_v38 = vmul.f32 0.2, %v1774_v37  ;;  %v1532_v39 = vpop.f32.mrf.mxu0  ;;  %vm1852_vm14 = vcmp.ge.f32.partialorder %v1774_v37, 0.0 }
 0x24f   : > { %v1533_v46 = vadd.f32 %v2986_v42, %v1532_v39 }
 0x250   : > { %v1916_v55 = vsel %vm1852_vm14, %v1774_v37, %v1884_v38 }
 0x251   : > { %vm1584_vm1 = vcmp.ge.f32.partialorder %v1533_v46, 0.0  ;;  %v1616_v4 = vmul.f32 0.2, %v1533_v46  ;;  %v1952_v7 = vmul.f32 %v3037_v33, %v1916_v55 }
 0x253   : > { %v1648_v62 = vsel %vm1584_vm1, %v1533_v46, %v1616_v4  ;;  %v1776_v63 = vpop.f32.mrf.mxu1  ;;  %v1986_v35 = vsel %vm535_vm0, %v1952_v7, 0.0 }
 0x254   : > { %v1670_v2 = vpack.c.bf16 %v1648_v62, %v1647_v12  ;;  %v1777_v50 = vadd.f32 %v3031_v32, %v1776_v63  ;;  %1987 = vadd.xlane.f32.xlu0 %v1986_v35 }
 0x256   : > { %v1885_v1 = vmul.f32 0.2, %v1777_v50  ;;  %v1535_v6 = vpop.f32.mrf.mxu0  ;;  %2446 = vmatmul.msk.bf16.gmra.mxu1 %vm1713_vm11, %v1670_v2  ;;  %vm1853_vm2 = vcmp.ge.f32.partialorder %v1777_v50, 0.0 }
 0x257   : > { %v1536_v44 = vadd.f32 %v2986_v42, %v1535_v6 }
 0x258   : > { %v1917_v8 = vsel %vm1853_vm2, %v1777_v50, %v1885_v1 }
 0x259   : > { %v1953_v43 = vmul.f32 %v3037_v33, %v1917_v8  ;;  %v1617_v56 = vmul.f32 0.2, %v1536_v44  ;;  %vm1585_vm4 = vcmp.ge.f32.partialorder %v1536_v44, 0.0 }
 0x25b   : > { %v1778_v48 = vpop.f32.mrf.mxu1  ;;  %v1989_v53 = vsel %vm535_vm0, %v1953_v43, 0.0  ;;  %v1649_v45 = vsel %vm1585_vm4, %v1536_v44, %v1617_v56 }
 0x25c   : > { %v1779_v57 = vadd.f32 %v3031_v32, %v1778_v48  ;;  %1990 = vadd.xlane.f32.xlu1 %v1989_v53 }
 0x25e   : > { %v1886_v47 = vmul.f32 0.2, %v1779_v57  ;;  %v1537_v10 = vpop.f32.mrf.mxu0  ;;  %vm1854_vm3 = vcmp.ge.f32.partialorder %v1779_v57, 0.0 }
 0x25f   : > { %v1538_v21 = vadd.f32 %v2986_v42, %v1537_v10 }
 0x260   : > { %v1918_v59 = vsel %vm1854_vm3, %v1779_v57, %v1886_v47 }
 0x261   : > { %vm1586_vm5 = vcmp.ge.f32.partialorder %v1538_v21, 0.0  ;;  %v1618_v61 = vmul.f32 0.2, %v1538_v21  ;;  %v1954_v0 = vmul.f32 %v3037_v33, %v1918_v59 }
 0x263   : > { %v1650_v34 = vsel %vm1586_vm5, %v1538_v21, %v1618_v61  ;;  %v1781_v49 = vpop.f32.mrf.mxu1  ;;  %v1992_v3 = vsel %vm535_vm0, %v1954_v0, 0.0 }
 0x264   : > { %v1671_v19 = vpack.c.bf16 %v1650_v34, %v1649_v45  ;;  %v1782_v22 = vadd.f32 %v3031_v32, %v1781_v49  ;;  %1993 = vadd.xlane.f32.xlu1 %v1992_v3 }
 0x266   : > { %v1887_v17 = vmul.f32 0.2, %v1782_v22  ;;  %v1540_v23 = vpop.f32.mrf.mxu0  ;;  %2447 = vmatmul.msk.bf16.gmra.mxu1 %vm1713_vm11, %v1671_v19  ;;  %vm1855_vm6 = vcmp.ge.f32.partialorder %v1782_v22, 0.0 }
 0x267   : > { %v1541_v25 = vadd.f32 %v2986_v42, %v1540_v23 }
 0x268   : > { %v1919_v51 = vsel %vm1855_vm6, %v1782_v22, %v1887_v17 }
 0x269   : > { %v1955_v24 = vmul.f32 %v3037_v33, %v1919_v51  ;;  %v1619_v30 = vmul.f32 0.2, %v1541_v25  ;;  %vm1587_vm8 = vcmp.ge.f32.partialorder %v1541_v25, 0.0 }
 0x26b   : > { %v1783_v27 = vpop.f32.mrf.mxu1  ;;  %v1995_v29 = vsel %vm535_vm0, %v1955_v24, 0.0  ;;  %v1651_v52 = vsel %vm1587_vm8, %v1541_v25, %v1619_v30 }
 0x26c   : > { %v1784_v13 = vadd.f32 %v3031_v32, %v1783_v27  ;;  %1996 = vadd.xlane.f32.xlu2 %v1995_v29 }
 0x26e   : > { %v1888_v15 = vmul.f32 0.2, %v1784_v13  ;;  %v1542_v18 = vpop.f32.mrf.mxu0  ;;  %vm1856_vm7 = vcmp.ge.f32.partialorder %v1784_v13, 0.0 }
 0x26f   : > { %v1543_v26 = vadd.f32 %v2986_v42, %v1542_v18 }
 0x270   : > { %v1920_v28 = vsel %vm1856_vm7, %v1784_v13, %v1888_v15 }
 0x271   : > { %vm1588_vm9 = vcmp.ge.f32.partialorder %v1543_v26, 0.0  ;;  %v1620_v41 = vmul.f32 0.2, %v1543_v26  ;;  %v1956_v60 = vmul.f32 %v3037_v33, %v1920_v28 }
 0x273   : > { %v1652_v54 = vsel %vm1588_vm9, %v1543_v26, %v1620_v41  ;;  %v1786_v58 = vpop.f32.mrf.mxu1  ;;  %v1998_v5 = vsel %vm535_vm0, %v1956_v60, 0.0 }
 0x274   : > { %v1672_v14 = vpack.c.bf16 %v1652_v54, %v1651_v52  ;;  %v1787_v11 = vadd.f32 %v3031_v32, %v1786_v58  ;;  %1999 = vadd.xlane.f32.xlu2 %v1998_v5 }
 0x276   : > { %vm1857_vm10 = vcmp.ge.f32.partialorder %v1787_v11, 0.0  ;;  %v1889_v16 = vmul.f32 0.2, %v1787_v11  ;;  %v1545_v9 = vpop.f32.mrf.mxu0  ;;  %2448 = vmatmul.msk.bf16.gmra.mxu1 %vm1713_vm11, %v1672_v14 }
 0x277   : > { %v1546_v31 = vadd.f32 %v2986_v42, %v1545_v9 }
 0x278   : > { %v1921_v20 = vsel %vm1857_vm10, %v1787_v11, %v1889_v16 }
 0x279   : > { %v1957_v36 = vmul.f32 %v3037_v33, %v1921_v20  ;;  %v1621_v55 = vmul.f32 0.2, %v1546_v31  ;;  %vm1589_vm13 = vcmp.ge.f32.partialorder %v1546_v31, 0.0 }
 0x27b   : > { %v1788_v37 = vpop.f32.mrf.mxu1  ;;  %v2001_v38 = vsel %vm535_vm0, %v1957_v36, 0.0  ;;  %v1653_v63 = vsel %vm1589_vm13, %v1546_v31, %v1621_v55 }
 0x27c   : > { %v1789_v39 = vadd.f32 %v3031_v32, %v1788_v37  ;;  %2002 = vadd.xlane.f32.xlu0 %v2001_v38 }
 0x27e   : > { %v1890_v40 = vmul.f32 0.2, %v1789_v39  ;;  %v1547_v46 = vpop.f32.mrf.mxu0  ;;  %vm1858_vm12 = vcmp.ge.f32.partialorder %v1789_v39, 0.0 }
 0x27f   : > { %v1548_v4 = vadd.f32 %v2986_v42, %v1547_v46 }
 0x280   : > { %v1922_v7 = vsel %vm1858_vm12, %v1789_v39, %v1890_v40 }
 0x281   : > { %vm1590_vm14 = vcmp.ge.f32.partialorder %v1548_v4, 0.0  ;;  %v1622_v12 = vmul.f32 0.2, %v1548_v4  ;;  %v1958_v62 = vmul.f32 %v3037_v33, %v1922_v7 }
 0x283   : > { %v1654_v35 = vsel %vm1590_vm14, %v1548_v4, %v1622_v12  ;;  %v1791_v2 = vpop.f32.mrf.mxu1  ;;  %v2004_v50 = vsel %vm535_vm0, %v1958_v62, 0.0 }
 0x284   : > { %v1673_v1 = vpack.c.bf16 %v1654_v35, %v1653_v63  ;;  %v1792_v6 = vadd.f32 %v3031_v32, %v1791_v2  ;;  %2005 = vadd.xlane.f32.xlu1 %v2004_v50 }
 0x286   : > { %vm1859_vm15 = vcmp.ge.f32.partialorder %v1792_v6, 0.0  ;;  %v1891_v8 = vmul.f32 0.2, %v1792_v6  ;;  %v1550_v43 = vpop.f32.mrf.mxu0  ;;  %2449 = vmatmul.msk.bf16.gmra.mxu1 %vm1713_vm11, %v1673_v1 }
 0x287   : > { %v1551_v53 = vadd.f32 %v2986_v42, %v1550_v43 }
 0x288   : > { %v1923_v44 = vsel %vm1859_vm15, %v1792_v6, %v1891_v8  ;;  %vm2115_vm15 = vcmask 7168  }
 0x289   : > { %v1959_v48 = vmul.f32 %v3037_v33, %v1923_v44  ;;  %v1623_v59 = vmul.f32 0.2, %v1551_v53  ;;  %vm1591_vm2 = vcmp.ge.f32.partialorder %v1551_v53, 0.0 }
 0x28b   : > { %v1793_v57 = vpop.f32.mrf.mxu1  ;;  %v2007_v47 = vsel %vm535_vm0, %v1959_v48, 0.0  ;;  %v1655_v49 = vsel %vm1591_vm2, %v1551_v53, %v1623_v59 }
 0x28c   : > { %v1794_v10 = vadd.f32 %v3031_v32, %v1793_v57  ;;  %2008 = vadd.xlane.f32.xlu2 %v2007_v47 }
 0x28e   : > { %vm1860_vm1 = vcmp.ge.f32.partialorder %v1794_v10, 0.0  ;;  %v1892_v56 = vmul.f32 0.2, %v1794_v10  ;;  %v1552_v21 = vpop.f32.mrf.mxu0 }
 0x28f   : > { %v1553_v61 = vadd.f32 %v2986_v42, %v1552_v21 }
 0x290   : > { %v1924_v0 = vsel %vm1860_vm1, %v1794_v10, %v1892_v56 }
 0x291   : > { %vm1592_vm3 = vcmp.ge.f32.partialorder %v1553_v61, 0.0  ;;  %v1624_v45 = vmul.f32 0.2, %v1553_v61  ;;  %v1960_v34 = vmul.f32 %v3037_v33, %v1924_v0 }
 0x293   : > { %v1656_v3 = vsel %vm1592_vm3, %v1553_v61, %v1624_v45  ;;  %v1796_v19 = vpop.f32.mrf.mxu1  ;;  %v2010_v22 = vsel %vm535_vm0, %v1960_v34, 0.0 }
 0x294   : > { %v1674_v17 = vpack.c.bf16 %v1656_v3, %v1655_v49  ;;  %v1797_v23 = vadd.f32 %v3031_v32, %v1796_v19  ;;  %2011 = vadd.xlane.f32.xlu0 %v2010_v22 }
 0x296   : > { %vm1861_vm4 = vcmp.ge.f32.partialorder %v1797_v23, 0.0  ;;  %v1893_v51 = vmul.f32 0.2, %v1797_v23  ;;  %v1555_v24 = vpop.f32.mrf.mxu0  ;;  %2450 = vmatmul.msk.bf16.gmra.mxu1 %vm1713_vm11, %v1674_v17 }
 0x297   : > { %v1556_v29 = vadd.f32 %v2986_v42, %v1555_v24 }
 0x298   : > { %v1925_v25 = vsel %vm1861_vm4, %v1797_v23, %v1893_v51 }
 0x299   : > { %v1961_v27 = vmul.f32 %v3037_v33, %v1925_v25  ;;  %v1625_v28 = vmul.f32 0.2, %v1556_v29  ;;  %vm1593_vm6 = vcmp.ge.f32.partialorder %v1556_v29, 0.0 }
 0x29b   : > { %v1798_v13 = vpop.f32.mrf.mxu1  ;;  %v2013_v15 = vsel %vm535_vm0, %v1961_v27, 0.0  ;;  %v1657_v58 = vsel %vm1593_vm6, %v1556_v29, %v1625_v28 }
 0x29c   : > { %v1799_v18 = vadd.f32 %v3031_v32, %v1798_v13  ;;  %2014 = vadd.xlane.f32.xlu1 %v2013_v15 }
 0x29e   : > { %vm1862_vm5 = vcmp.ge.f32.partialorder %v1799_v18, 0.0  ;;  %v1894_v30 = vmul.f32 0.2, %v1799_v18  ;;  %v1557_v26 = vpop.f32.mrf.mxu0 }
 0x29f   : > { %v1558_v41 = vadd.f32 %v2986_v42, %v1557_v26 }
 0x2a0   : > { %v1926_v60 = vsel %vm1862_vm5, %v1799_v18, %v1894_v30 }
 0x2a1   : > { %vm1594_vm7 = vcmp.ge.f32.partialorder %v1558_v41, 0.0  ;;  %v1626_v52 = vmul.f32 0.2, %v1558_v41  ;;  %v1962_v54 = vmul.f32 %v3037_v33, %v1926_v60 }
 0x2a3   : > { %v1658_v5 = vsel %vm1594_vm7, %v1558_v41, %v1626_v52  ;;  %v1801_v14 = vpop.f32.mrf.mxu1  ;;  %v2016_v11 = vsel %vm535_vm0, %v1962_v54, 0.0 }
 0x2a4   : > { %v1675_v16 = vpack.c.bf16 %v1658_v5, %v1657_v58  ;;  %v1802_v9 = vadd.f32 %v3031_v32, %v1801_v14  ;;  %2017 = vadd.xlane.f32.xlu2 %v2016_v11 }
 0x2a6   : > { %vm1863_vm8 = vcmp.ge.f32.partialorder %v1802_v9, 0.0  ;;  %v1895_v20 = vmul.f32 0.2, %v1802_v9  ;;  %2451 = vmatmul.msk.bf16.gmra.mxu1 %vm1713_vm11, %v1675_v16 }
 0x2a8   : > { %v1927_v36 = vsel %vm1863_vm8, %v1802_v9, %v1895_v20 }
 0x2a9   : > { %v1963_v31 = vmul.f32 %v3037_v33, %v1927_v36 }
 0x2ab   : > { %v1803_v37 = vpop.f32.mrf.mxu1  ;;  %v2019_v38 = vsel %vm535_vm0, %v1963_v31, 0.0 }
 0x2ac   : > { %v1804_v39 = vadd.f32 %v3031_v32, %v1803_v37  ;;  %v1560_v40 = vpop.f32.mrf.mxu2  ;;  %2020 = vadd.xlane.f32.xlu0 %v2019_v38 }
 0x2ad   : > { %v1561_v4 = vadd.f32 %v2986_v42, %v1560_v40 }
 0x2ae   : > { %vm1864_vm9 = vcmp.ge.f32.partialorder %v1804_v39, 0.0  ;;  %v1896_v46 = vmul.f32 0.2, %v1804_v39 }
 0x2af   : > { %v1627_v2 = vmul.f32 0.2, %v1561_v4  ;;  %vm1595_vm10 = vcmp.ge.f32.partialorder %v1561_v4, 0.0 }
 0x2b0   : > { %v1928_v55 = vsel %vm1864_vm9, %v1804_v39, %v1896_v46 }
 0x2b1   : > { %v1964_v7 = vmul.f32 %v3037_v33, %v1928_v55  ;;  %v1659_v43 = vsel %vm1595_vm10, %v1561_v4, %v1627_v2 }
 0x2b3   : > { %v1806_v12 = vpop.f32.mrf.mxu1  ;;  %v2022_v62 = vsel %vm535_vm0, %v1964_v7, 0.0 }
 0x2b4   : > { %v1807_v63 = vadd.f32 %v3031_v32, %v1806_v12  ;;  %v1562_v35 = vpop.f32.mrf.mxu2  ;;  %2023 = vadd.xlane.f32.xlu1 %v2022_v62 }
 0x2b5   : > { %v1563_v50 = vadd.f32 %v2986_v42, %v1562_v35  ;;  %v3107_v42 = vld [vmem:[#allocation2] ss:$0 sm:$0xff] }
 0x2b6   : > { %vm1865_vm12 = vcmp.ge.f32.partialorder %v1807_v63, 0.0  ;;  %v1897_v1 = vmul.f32 0.2, %v1807_v63 }
 0x2b7   : > { %vm1596_vm13 = vcmp.ge.f32.partialorder %v1563_v50, 0.0  ;;  %v1628_v6 = vmul.f32 0.2, %v1563_v50 }
 0x2b8   : > { %v1929_v8 = vsel %vm1865_vm12, %v1807_v63, %v1897_v1 }
 0x2b9   : > { %v1660_v44 = vsel %vm1596_vm13, %v1563_v50, %v1628_v6  ;;  %v1965_v48 = vmul.f32 %v3037_v33, %v1929_v8 }
 0x2ba   : > { %v1676_v53 = vpack.c.bf16 %v1660_v44, %v1659_v43 }
 0x2bb   : > { %v1808_v57 = vpop.f32.mrf.mxu1  ;;  %v2025_v47 = vsel %vm535_vm0, %v1965_v48, 0.0 }
 0x2bc   : > { %v1809_v10 = vadd.f32 %v3031_v32, %v1808_v57  ;;  %2452 = vmatmul.msk.bf16.gmra.mxu1 %vm1713_vm11, %v1676_v53  ;;  %2026 = vadd.xlane.f32.xlu2 %v2025_v47 }
 0x2be   : > { %vm1866_vm14 = vcmp.ge.f32.partialorder %v1809_v10, 0.0  ;;  %v1898_v56 = vmul.f32 0.2, %v1809_v10 }
 0x2bf   : > { %v1985_v21 = vpop.xlane.xlu0 %1984 }
 0x2c0   : > { %v2083_v59 = vadd.f32 %v3107_v42, %v1985_v21  ;;  %v1930_v61 = vsel %vm1866_vm14, %v1809_v10, %v1898_v56 }
 0x2c1   : > { %v1966_v0 = vmul.f32 %v3037_v33, %v1930_v61 }
 0x2c2   : > { %2116 = vst.msk [vmem:[%s3112_s22] sm:$0xff] %vm2115_vm15, %v2083_v59 }
 0x2c3   : > { %v1811_v45 = vpop.f32.mrf.mxu1  ;;  %v2028_v34 = vsel %vm535_vm0, %v1966_v0, 0.0 }
 0x2c4   : > { %v1812_v49 = vadd.f32 %v3031_v32, %v1811_v45  ;;  %2029 = vadd.xlane.f32.xlu0 %v2028_v34 }
 0x2c6   : > { %vm1867_vm11 = vcmp.ge.f32.partialorder %v1812_v49, 0.0  ;;  %v1899_v3 = vmul.f32 0.2, %v1812_v49 }
 0x2c7   : > { %v1988_v19 = vpop.xlane.xlu0 %1987 }
 0x2c8   : > { %v2084_v22 = vadd.f32 %v3107_v42, %v1988_v19  ;;  %v1931_v17 = vsel %vm1867_vm11, %v1812_v49, %v1899_v3 }
 0x2c9   : > { %v1967_v23 = vmul.f32 %v3037_v33, %v1931_v17 }
 0x2ca   : > { %2117 = vst.msk [vmem:[%s3112_s22 + $0x8] sm:$0xff] %vm2115_vm15, %v2084_v22 }
 0x2cb   : > { %v1813_v51 = vpop.f32.mrf.mxu1  ;;  %v2031_v24 = vsel %vm535_vm0, %v1967_v23, 0.0 }
 0x2cc   : > { %v1814_v25 = vadd.f32 %v3031_v32, %v1813_v51  ;;  %2032 = vadd.xlane.f32.xlu1 %v2031_v24 }
 0x2ce   : > { %vm1868_vm1 = vcmp.ge.f32.partialorder %v1814_v25, 0.0  ;;  %v1900_v27 = vmul.f32 0.2, %v1814_v25 }
 0x2cf   : > { %v1991_v29 = vpop.xlane.xlu1 %1990 }
 0x2d0   : > { %v2085_v13 = vadd.f32 %v3107_v42, %v1991_v29  ;;  %v1932_v15 = vsel %vm1868_vm1, %v1814_v25, %v1900_v27 }
 0x2d1   : > { %v1968_v18 = vmul.f32 %v3037_v33, %v1932_v15 }
 0x2d2   : > { %2118 = vst.msk [vmem:[%s3112_s22 + $0x10] sm:$0xff] %vm2115_vm15, %v2085_v13 }
 0x2d3   : > { %v1816_v30 = vpop.f32.mrf.mxu1  ;;  %v2034_v26 = vsel %vm535_vm0, %v1968_v18, 0.0 }
 0x2d4   : > { %v1817_v28 = vadd.f32 %v3031_v32, %v1816_v30  ;;  %2035 = vadd.xlane.f32.xlu2 %v2034_v26 }
 0x2d6   : > { %vm1869_vm2 = vcmp.ge.f32.partialorder %v1817_v28, 0.0  ;;  %v1901_v41 = vmul.f32 0.2, %v1817_v28 }
 0x2d7   : > { %v1994_v60 = vpop.xlane.xlu1 %1993 }
 0x2d8   : > { %v2086_v52 = vadd.f32 %v3107_v42, %v1994_v60  ;;  %v1933_v54 = vsel %vm1869_vm2, %v1817_v28, %v1901_v41 }
 0x2d9   : > { %v1969_v58 = vmul.f32 %v3037_v33, %v1933_v54 }
 0x2da   : > { %2119 = vst.msk [vmem:[%s3112_s22 + $0x18] sm:$0xff] %vm2115_vm15, %v2086_v52 }
 0x2db   : > { %v1818_v5 = vpop.f32.mrf.mxu1  ;;  %v2037_v14 = vsel %vm535_vm0, %v1969_v58, 0.0 }
 0x2dc   : > { %v1819_v11 = vadd.f32 %v3031_v32, %v1818_v5  ;;  %2038 = vadd.xlane.f32.xlu0 %v2037_v14 }
 0x2de   : > { %vm1870_vm3 = vcmp.ge.f32.partialorder %v1819_v11, 0.0  ;;  %v1902_v16 = vmul.f32 0.2, %v1819_v11 }
 0x2df   : > { %v1997_v9 = vpop.xlane.xlu2 %1996 }
 0x2e0   : > { %v2087_v20 = vadd.f32 %v3107_v42, %v1997_v9  ;;  %v1934_v36 = vsel %vm1870_vm3, %v1819_v11, %v1902_v16 }
 0x2e1   : > { %v1970_v31 = vmul.f32 %v3037_v33, %v1934_v36 }
 0x2e2   : > { %2120 = vst.msk [vmem:[%s3112_s22 + $0x20] sm:$0xff] %vm2115_vm15, %v2087_v20 }
 0x2e3   : > { %v1821_v37 = vpop.f32.mrf.mxu1  ;;  %v2040_v38 = vsel %vm535_vm0, %v1970_v31, 0.0 }
 0x2e4   : > { %v1822_v39 = vadd.f32 %v3031_v32, %v1821_v37  ;;  %2041 = vadd.xlane.f32.xlu1 %v2040_v38 }
 0x2e6   : > { %vm1871_vm4 = vcmp.ge.f32.partialorder %v1822_v39, 0.0  ;;  %v1903_v40 = vmul.f32 0.2, %v1822_v39 }
 0x2e7   : > { %v2000_v46 = vpop.xlane.xlu2 %1999 }
 0x2e8   : > { %v2088_v55 = vadd.f32 %v3107_v42, %v2000_v46  ;;  %v1935_v4 = vsel %vm1871_vm4, %v1822_v39, %v1903_v40 }
 0x2e9   : > { %v1971_v7 = vmul.f32 %v3037_v33, %v1935_v4 }
 0x2ea   : > { %2121 = vst.msk [vmem:[%s3112_s22 + $0x28] sm:$0xff] %vm2115_vm15, %v2088_v55 }
 0x2eb   : > { %v1823_v12 = vpop.f32.mrf.mxu1  ;;  %v2043_v62 = vsel %vm535_vm0, %v1971_v7, 0.0 }
 0x2ec   : > { %v1824_v63 = vadd.f32 %v3031_v32, %v1823_v12  ;;  %2044 = vadd.xlane.f32.xlu2 %v2043_v62 }
 0x2ee   : > { %vm1872_vm5 = vcmp.ge.f32.partialorder %v1824_v63, 0.0  ;;  %v1904_v35 = vmul.f32 0.2, %v1824_v63 }
 0x2ef   : > { %v2003_v2 = vpop.xlane.xlu0 %2002 }
 0x2f0   : > { %v2089_v50 = vadd.f32 %v3107_v42, %v2003_v2  ;;  %v1936_v1 = vsel %vm1872_vm5, %v1824_v63, %v1904_v35 }
 0x2f1   : > { %v1972_v6 = vmul.f32 %v3037_v33, %v1936_v1 }
 0x2f2   : > { %2122 = vst.msk [vmem:[%s3112_s22 + $0x30] sm:$0xff] %vm2115_vm15, %v2089_v50 }
 0x2f3   : > { %v1826_v8 = vpop.f32.mrf.mxu1  ;;  %v2046_v43 = vsel %vm535_vm0, %v1972_v6, 0.0 }
 0x2f4   : > { %v1827_v44 = vadd.f32 %v3031_v32, %v1826_v8  ;;  %2047 = vadd.xlane.f32.xlu0 %v2046_v43 }
 0x2f6   : > { %vm1873_vm6 = vcmp.ge.f32.partialorder %v1827_v44, 0.0  ;;  %v1905_v48 = vmul.f32 0.2, %v1827_v44 }
 0x2f7   : > { %v2006_v53 = vpop.xlane.xlu1 %2005 }
 0x2f8   : > { %v2090_v57 = vadd.f32 %v3107_v42, %v2006_v53  ;;  %v1937_v47 = vsel %vm1873_vm6, %v1827_v44, %v1905_v48 }
 0x2f9   : > { %v1973_v10 = vmul.f32 %v3037_v33, %v1937_v47 }
 0x2fa   : > { %2123 = vst.msk [vmem:[%s3112_s22 + $0x38] sm:$0xff] %vm2115_vm15, %v2090_v57 }
 0x2fb   : > { %v1828_v56 = vpop.f32.mrf.mxu1  ;;  %v2049_v21 = vsel %vm535_vm0, %v1973_v10, 0.0 }
 0x2fc   : > { %v1829_v59 = vadd.f32 %v3031_v32, %v1828_v56  ;;  %2050 = vadd.xlane.f32.xlu1 %v2049_v21 }
 0x2fe   : > { %vm1874_vm7 = vcmp.ge.f32.partialorder %v1829_v59, 0.0  ;;  %v1906_v61 = vmul.f32 0.2, %v1829_v59 }
 0x2ff   : > { %v2009_v0 = vpop.xlane.xlu2 %2008 }
 0x300   : > { %v2091_v45 = vadd.f32 %v3107_v42, %v2009_v0  ;;  %v1938_v34 = vsel %vm1874_vm7, %v1829_v59, %v1906_v61 }
 0x301   : > { %v1974_v49 = vmul.f32 %v3037_v33, %v1938_v34 }
 0x302   : > { %2124 = vst.msk [vmem:[%s3112_s22 + $0x40] sm:$0xff] %vm2115_vm15, %v2091_v45 }
 0x303   : > { %v1831_v3 = vpop.f32.mrf.mxu1  ;;  %v2052_v19 = vsel %vm535_vm0, %v1974_v49, 0.0 }
 0x304   : > { %v1832_v22 = vadd.f32 %v3031_v32, %v1831_v3  ;;  %2053 = vadd.xlane.f32.xlu2 %v2052_v19 }
 0x306   : > { %vm1875_vm8 = vcmp.ge.f32.partialorder %v1832_v22, 0.0  ;;  %v1907_v17 = vmul.f32 0.2, %v1832_v22 }
 0x307   : > { %v2012_v23 = vpop.xlane.xlu0 %2011 }
 0x308   : > { %v2092_v51 = vadd.f32 %v3107_v42, %v2012_v23  ;;  %v1939_v24 = vsel %vm1875_vm8, %v1832_v22, %v1907_v17 }
 0x309   : > { %v1975_v25 = vmul.f32 %v3037_v33, %v1939_v24 }
 0x30a   : > { %2125 = vst.msk [vmem:[%s3112_s22 + $0x48] sm:$0xff] %vm2115_vm15, %v2092_v51 }
 0x30b   : > { %v1833_v27 = vpop.f32.mrf.mxu1  ;;  %v2055_v29 = vsel %vm535_vm0, %v1975_v25, 0.0 }
 0x30c   : > { %v1834_v13 = vadd.f32 %v3031_v32, %v1833_v27  ;;  %2056 = vadd.xlane.f32.xlu0 %v2055_v29 }
 0x30e   : > { %vm1876_vm9 = vcmp.ge.f32.partialorder %v1834_v13, 0.0  ;;  %v1908_v15 = vmul.f32 0.2, %v1834_v13 }
 0x30f   : > { %v2015_v18 = vpop.xlane.xlu1 %2014 }
 0x310   : > { %v2093_v30 = vadd.f32 %v3107_v42, %v2015_v18  ;;  %v1940_v26 = vsel %vm1876_vm9, %v1834_v13, %v1908_v15 }
 0x311   : > { %v1976_v28 = vmul.f32 %v3037_v33, %v1940_v26 }
 0x312   : > { %2126 = vst.msk [vmem:[%s3112_s22 + $0x50] sm:$0xff] %vm2115_vm15, %v2093_v30 }
 0x313   : > { %v1836_v41 = vpop.f32.mrf.mxu1  ;;  %v2058_v60 = vsel %vm535_vm0, %v1976_v28, 0.0 }
 0x314   : > { %v1837_v52 = vadd.f32 %v3031_v32, %v1836_v41  ;;  %2059 = vadd.xlane.f32.xlu1 %v2058_v60 }
 0x316   : > { %vm1877_vm10 = vcmp.ge.f32.partialorder %v1837_v52, 0.0  ;;  %v1909_v54 = vmul.f32 0.2, %v1837_v52 }
 0x317   : > { %v2018_v58 = vpop.xlane.xlu2 %2017 }
 0x318   : > { %v2094_v5 = vadd.f32 %v3107_v42, %v2018_v58  ;;  %v1941_v14 = vsel %vm1877_vm10, %v1837_v52, %v1909_v54 }
 0x319   : > { %v1977_v11 = vmul.f32 %v3037_v33, %v1941_v14 }
 0x31a   : > { %2127 = vst.msk [vmem:[%s3112_s22 + $0x58] sm:$0xff] %vm2115_vm15, %v2094_v5 }
 0x31b   : > { %v1838_v16 = vpop.f32.mrf.mxu1  ;;  %v2061_v9 = vsel %vm535_vm0, %v1977_v11, 0.0 }
 0x31c   : > { %v1839_v20 = vadd.f32 %v3031_v32, %v1838_v16  ;;  %2062 = vadd.xlane.f32.xlu2 %v2061_v9 }
 0x31e   : > { %vm1878_vm12 = vcmp.ge.f32.partialorder %v1839_v20, 0.0  ;;  %v1910_v36 = vmul.f32 0.2, %v1839_v20 }
 0x31f   : > { %v2021_v31 = vpop.xlane.xlu0 %2020 }
 0x320   : > { %v2095_v37 = vadd.f32 %v3107_v42, %v2021_v31  ;;  %v1942_v38 = vsel %vm1878_vm12, %v1839_v20, %v1910_v36 }
 0x321   : > { %v1978_v39 = vmul.f32 %v3037_v33, %v1942_v38 }
 0x322   : > { %2128 = vst.msk [vmem:[%s3112_s22 + $0x60] sm:$0xff] %vm2115_vm15, %v2095_v37 }
 0x323   : > { %v1841_v40 = vpop.f32.mrf.mxu1  ;;  %v2064_v46 = vsel %vm535_vm0, %v1978_v39, 0.0 }
 0x324   : > { %v1842_v55 = vadd.f32 %v3031_v32, %v1841_v40  ;;  %2065 = vadd.xlane.f32.xlu0 %v2064_v46 }
 0x326   : > { %vm1879_vm13 = vcmp.ge.f32.partialorder %v1842_v55, 0.0  ;;  %v1911_v4 = vmul.f32 0.2, %v1842_v55 }
 0x327   : > { %v2024_v7 = vpop.xlane.xlu1 %2023 }
 0x328   : > { %v2096_v12 = vadd.f32 %v3107_v42, %v2024_v7  ;;  %v1943_v62 = vsel %vm1879_vm13, %v1842_v55, %v1911_v4 }
 0x329   : > { %v1979_v63 = vmul.f32 %v3037_v33, %v1943_v62 }
 0x32a   : > { %2129 = vst.msk [vmem:[%s3112_s22 + $0x68] sm:$0xff] %vm2115_vm15, %v2096_v12 }
 0x32b   : > { %v1843_v35 = vpop.f32.mrf.mxu1  ;;  %v2067_v2 = vsel %vm535_vm0, %v1979_v63, 0.0 }
 0x32c   : > { %v1844_v50 = vadd.f32 %v3031_v32, %v1843_v35  ;;  %2068 = vadd.xlane.f32.xlu1 %v2067_v2 }
 0x32e   : > { %vm1880_vm14 = vcmp.ge.f32.partialorder %v1844_v50, 0.0  ;;  %v1912_v1 = vmul.f32 0.2, %v1844_v50 }
 0x32f   : > { %v2027_v6 = vpop.xlane.xlu2 %2026 }
 0x330   : > { %v2097_v8 = vadd.f32 %v3107_v42, %v2027_v6  ;;  %v1944_v43 = vsel %vm1880_vm14, %v1844_v50, %v1912_v1 }
 0x331   : > { %v1980_v44 = vmul.f32 %v3037_v33, %v1944_v43 }
 0x332   : > { %2130 = vst.msk [vmem:[%s3112_s22 + $0x70] sm:$0xff] %vm2115_vm15, %v2097_v8 }
 0x333   : > { %v2070_v48 = vsel %vm535_vm0, %v1980_v44, 0.0 }
 0x334   : > { %2071 = vadd.xlane.f32.xlu2 %v2070_v48 }
 0x337   : > { %v2030_v53 = vpop.xlane.xlu0 %2029 }
 0x338   : > { %v2098_v57 = vadd.f32 %v3107_v42, %v2030_v53 }
 0x339   : > { %v1846_v47 = vpop.f32.mrf.mxu1 }
 0x33a   : > { %2131 = vst.msk [vmem:[%s3112_s22 + $0x78] sm:$0xff] %vm2115_vm15, %v2098_v57  ;;  %v1847_v10 = vadd.f32 %v3031_v32, %v1846_v47 }
 0x33c   : > { %vm1881_vm11 = vcmp.ge.f32.partialorder %v1847_v10, 0.0  ;;  %v1913_v56 = vmul.f32 0.2, %v1847_v10 }
 0x33e   : > { %v1945_v21 = vsel %vm1881_vm11, %v1847_v10, %v1913_v56 }
 0x33f   : > { %v2033_v59 = vpop.xlane.xlu1 %2032  ;;  %v1981_v61 = vmul.f32 %v3037_v33, %v1945_v21 }
 0x340   : > { %v2099_v0 = vadd.f32 %v3107_v42, %v2033_v59 }
 0x341   : > { %v1848_v45 = vpop.f32.mrf.mxu1  ;;  %v2073_v34 = vsel %vm535_vm0, %v1981_v61, 0.0 }
 0x342   : > { %2132 = vst.msk [vmem:[%s3112_s22 + $0x80] sm:$0xff] %vm2115_vm15, %v2099_v0  ;;  %v1849_v49 = vadd.f32 %v3031_v32, %v1848_v45  ;;  %2074 = vadd.xlane.f32.xlu0 %v2073_v34 }
 0x344   : > { %vm1882_vm1 = vcmp.ge.f32.partialorder %v1849_v49, 0.0  ;;  %v1914_v3 = vmul.f32 0.2, %v1849_v49 }
 0x346   : > { %v1946_v19 = vsel %vm1882_vm1, %v1849_v49, %v1914_v3 }
 0x347   : > { %v2036_v22 = vpop.xlane.xlu2 %2035  ;;  %v1982_v17 = vmul.f32 %v3037_v33, %v1946_v19 }
 0x348   : > { %v2100_v23 = vadd.f32 %v3107_v42, %v2036_v22 }
 0x349   : > { %v2076_v51 = vsel %vm535_vm0, %v1982_v17, 0.0 }
 0x34a   : > { %2133 = vst.msk [vmem:[%s3112_s22 + $0x88] sm:$0xff] %vm2115_vm15, %v2100_v23  ;;  %2077 = vadd.xlane.f32.xlu1 %v2076_v51 }
 0x34f   : > { %v2039_v24 = vpop.xlane.xlu0 %2038 }
 0x350   : > { %v2101_v32 = vadd.f32 %v3107_v42, %v2039_v24 }
 0x352   : > { %2134 = vst.msk [vmem:[%s3112_s22 + $0x90] sm:$0xff] %vm2115_vm15, %v2101_v32 }
 0x357   : > { %v2042_v25 = vpop.xlane.xlu1 %2041 }
 0x358   : > { %v2102_v27 = vadd.f32 %v3107_v42, %v2042_v25 }
 0x35a   : > { %2135 = vst.msk [vmem:[%s3112_s22 + $0x98] sm:$0xff] %vm2115_vm15, %v2102_v27 }
 0x35f   : > { %v2045_v33 = vpop.xlane.xlu2 %2044 }
 0x360   : > { %v2103_v29 = vadd.f32 %v3107_v42, %v2045_v33 }
 0x362   : > { %2136 = vst.msk [vmem:[%s3112_s22 + $0xa0] sm:$0xff] %vm2115_vm15, %v2103_v29 }
 0x367   : > { %v2048_v13 = vpop.xlane.xlu0 %2047 }
 0x368   : > { %v2104_v15 = vadd.f32 %v3107_v42, %v2048_v13 }
 0x36a   : > { %2137 = vst.msk [vmem:[%s3112_s22 + $0xa8] sm:$0xff] %vm2115_vm15, %v2104_v15 }
 0x36f   : > { %v2051_v18 = vpop.xlane.xlu1 %2050 }
 0x370   : > { %v2105_v30 = vadd.f32 %v3107_v42, %v2051_v18 }
 0x372   : > { %2138 = vst.msk [vmem:[%s3112_s22 + $0xb0] sm:$0xff] %vm2115_vm15, %v2105_v30 }
 0x377   : > { %v2054_v26 = vpop.xlane.xlu2 %2053 }
 0x378   : > { %v2106_v28 = vadd.f32 %v3107_v42, %v2054_v26 }
 0x37a   : > { %2139 = vst.msk [vmem:[%s3112_s22 + $0xb8] sm:$0xff] %vm2115_vm15, %v2106_v28 }
 0x37f   : > { %v2057_v41 = vpop.xlane.xlu0 %2056 }
 0x380   : > { %v2107_v60 = vadd.f32 %v3107_v42, %v2057_v41 }
 0x382   : > { %2140 = vst.msk [vmem:[%s3112_s22 + $0xc0] sm:$0xff] %vm2115_vm15, %v2107_v60 }
 0x387   : > { %v2060_v52 = vpop.xlane.xlu1 %2059 }
 0x388   : > { %v2108_v54 = vadd.f32 %v3107_v42, %v2060_v52 }
 0x38a   : > { %2141 = vst.msk [vmem:[%s3112_s22 + $0xc8] sm:$0xff] %vm2115_vm15, %v2108_v54 }
 0x38f   : > { %v2063_v58 = vpop.xlane.xlu2 %2062 }
 0x390   : > { %v2109_v5 = vadd.f32 %v3107_v42, %v2063_v58 }
 0x392   : > { %2142 = vst.msk [vmem:[%s3112_s22 + $0xd0] sm:$0xff] %vm2115_vm15, %v2109_v5 }
 0x397   : > { %v2066_v14 = vpop.xlane.xlu0 %2065 }
 0x398   : > { %v2110_v11 = vadd.f32 %v3107_v42, %v2066_v14 }
 0x39a   : > { %2143 = vst.msk [vmem:[%s3112_s22 + $0xd8] sm:$0xff] %vm2115_vm15, %v2110_v11 }
 0x39f   : > { %v2069_v16 = vpop.xlane.xlu1 %2068 }
 0x3a0   : > { %v2111_v9 = vadd.f32 %v3107_v42, %v2069_v16 }
 0x3a2   : > { %2144 = vst.msk [vmem:[%s3112_s22 + $0xe0] sm:$0xff] %vm2115_vm15, %v2111_v9 }
 0x3a7   : > { %v2072_v20 = vpop.xlane.xlu2 %2071 }
 0x3a8   : > { %v2112_v36 = vadd.f32 %v3107_v42, %v2072_v20 }
 0x3aa   : > { %2145 = vst.msk [vmem:[%s3112_s22 + $0xe8] sm:$0xff] %vm2115_vm15, %v2112_v36 }
 0x3b5   : > { %v2075_v31 = vpop.xlane.xlu0 %2074 }
 0x3b6   : > { %v2113_v37 = vadd.f32 %v3107_v42, %v2075_v31 }
 0x3b8   : > { %2146 = vst.msk [vmem:[%s3112_s22 + $0xf0] sm:$0xff] %vm2115_vm15, %v2113_v37 }
 0x3bd   : > { %v2078_v38 = vpop.xlane.xlu1 %2077 }
 0x3be   : > { %v2114_v39 = vadd.f32 %v3107_v42, %v2078_v38 }
 0x3c0   : > { %2147 = vst.msk [vmem:[%s3112_s22 + $0xf8] sm:$0xff] %vm2115_vm15, %v2114_v39 }
 0x3c1 PF: > { %s23_s19 = sadd.s32 1, %s2534_s19  }
 0x3c2   : > { %p20_p4 = scmp.ge.s32.totalorder %s23_s19, 4  }
 0x3c4   :  { %22 = sbr.rel (!%p20_p4) target bundleno = 3 (0x3), region = 94 }

</bundles_post_ra>
